<compile_context>
chip_gen: v5e
topology: v5e:2x2
jax: 0.10.0
libtpu: 0.0.40
codegen_flags: <defaults>
</compile_context>

<pallas_src>
import functools

import jax
import jax.numpy as jnp
from jax.experimental import pallas as pl
from jax.experimental.pallas import tpu as pltpu

LANE = 128


def _default_tile_m():
    """Pick an M tile: smaller on 64 MiB-VMEM parts (v7x), larger on 128 MiB."""
    try:
        vmem_bytes = pltpu.get_tpu_info().vmem_capacity_bytes
    except Exception:
        vmem_bytes = 64 << 20
    return 512 if vmem_bytes <= (64 << 20) else 1024


_TILE_M = _default_tile_m()


# ----------------------------- Pallas kernel ------------------------------ #

def _matmul_bias_relu_kernel(a_ref, w_ref, b_ref, o_ref):
    """o = relu(a @ w + b) for one (tile_m, Np) output tile.

    a_ref: (tile_m, K) bf16  -- streamed per grid step (double-buffered)
    w_ref: (K, Np)     bf16  -- VMEM-resident across the grid
    b_ref: (1, Np)     f32   -- VMEM-resident
    o_ref: (tile_m, Np)      -- bf16 (intermediate layers) or f32 (last layer)
    """
    acc = jnp.dot(a_ref[...], w_ref[...], preferred_element_type=jnp.float32)
    acc = acc + b_ref[...]
    o_ref[...] = jnp.maximum(acc, 0.0).astype(o_ref.dtype)


def matmul_bias_relu(a, w, b_row, *, out_dtype):
    """relu(a @ w + b) via an M-gridded, software-pipelined Pallas kernel.

    a:     [M, K]  bf16
    w:     [K, Np] bf16  (Np a multiple of 128 -> lane-dense stores)
    b_row: [1, Np] f32
    returns [M, Np] out_dtype
    """
    M, K = a.shape
    Kw, Np = w.shape
    assert K == Kw and Np % LANE == 0

    # Full-extent block when M is small; otherwise fixed multiple-of-8 tiles.
    # The trailing partial tile (if any) is handled by Pallas boundary masking.
    tile_m = M if M <= _TILE_M else _TILE_M
    grid = (pl.cdiv(M, tile_m),)

    return pl.pallas_call(
        _matmul_bias_relu_kernel,
        out_shape=jax.ShapeDtypeStruct((M, Np), out_dtype),
        grid=grid,
        in_specs=[
            pl.BlockSpec((tile_m, K), lambda i: (i, 0)),   # streamed A tiles
            pl.BlockSpec((K, Np), lambda i: (0, 0)),       # resident weights
            pl.BlockSpec((1, Np), lambda i: (0, 0)),       # resident bias
        ],
        out_specs=pl.BlockSpec((tile_m, Np), lambda i: (i, 0)),
        compiler_params=pltpu.CompilerParams(
            dimension_semantics=("parallel",)),
    )(a, w, b_row)


# ------------------------------- glue (JAX) -------------------------------- #

def _im2col(x, k, s):
    """x: [N, H, W, C] -> patches [N*OH*OW, k*k*C] (valid padding, stride s).

    # TODO(synk): the patch matrix is still materialized in HBM (~k*k/s/s = 4x
    # the input for this 4x4/stride-2 conv).  Fusing the kh*kw reduction into
    # the Pallas kernel (shifted input slices + a VMEM f32 accumulator) would
    # remove that write+read entirely; done in bf16 here to halve its cost.
    """
    N, H, W, C = x.shape
    OH = (H - k) // s + 1
    OW = (W - k) // s + 1
    cols = []
    for i in range(k):
        for j in range(k):
            cols.append(x[:, i:i + s * OH:s, j:j + s * OW:s, :])  # [N,OH,OW,C]
    patches = jnp.stack(cols, axis=3)                  # [N, OH, OW, k*k, C]
    return patches.reshape(N * OH * OW, k * k * C), (N, OH, OW)


def conv2d_relu(x_nhwc, w_mat, b_row, cout, *, out_dtype, k=4, stride=2):
    """Conv2d(kernel=4, stride=2, padding=0) + ReLU via the Pallas matmul."""
    patches, (N, OH, OW) = _im2col(x_nhwc, k, stride)      # [M, k*k*Cin] bf16
    y = matmul_bias_relu(patches, w_mat, b_row, out_dtype=out_dtype)  # [M, Np]
    return y[:, :cout].reshape(N, OH, OW, cout)


# ----------------------------- ConvEncoder model --------------------------- #

def init_conv_encoder_params(key, depth=8):
    """Deterministic HWIO weights for the 4 conv layers (kernel 4, stride 2)."""
    specs = [(3, 1 * depth), (1 * depth, 2 * depth),
             (2 * depth, 4 * depth), (4 * depth, 8 * depth)]
    params = []
    for cin, cout in specs:
        key, kw_key, kb_key = jax.random.split(key, 3)
        fan_in = 4 * 4 * cin
        w = jax.random.normal(kw_key, (4, 4, cin, cout), jnp.float32) / jnp.sqrt(fan_in)
        b = 0.01 * jax.random.normal(kb_key, (cout,), jnp.float32)
        params.append((w, b))
    return params


def prepare_params(params):
    """One-time conversion: HWIO weights -> (K, Np) bf16 matmul weights with the
    output (lane) dim zero-padded to a multiple of 128; bias -> (1, Np) f32."""
    w_mats, b_rows, couts = [], [], []
    for (w, b) in params:
        kh, kw, cin, cout = w.shape
        K = kh * kw * cin
        pad = (-cout) % LANE
        w_mat = w.reshape(K, cout).astype(jnp.bfloat16)
        b_row = b.reshape(1, cout).astype(jnp.float32)
        if pad:
            w_mat = jnp.pad(w_mat, ((0, 0), (0, pad)))
            b_row = jnp.pad(b_row, ((0, 0), (0, pad)))
        w_mats.append(w_mat)
        b_rows.append(b_row)
        couts.append(cout)
    return tuple(w_mats), tuple(b_rows), tuple(couts)


@functools.partial(jax.jit, static_argnames=("couts",))
def conv_encoder_forward(obs_nchw, w_mats, b_rows, couts):
    """Mirrors ConvEncoder.forward: 4x (Conv2d k4 s2 + ReLU), then flatten.

    obs_nchw: [B, 3, H, W] float32 (PyTorch NCHW convention).
    Returns [B, 8*depth*OH4*OW4] flattened in PyTorch's (C, H, W) order.
    """
    x = jnp.transpose(obs_nchw, (0, 2, 3, 1)).astype(jnp.bfloat16)  # NHWC bf16
    n_layers = len(couts)
    for idx in range(n_layers):
        last = idx == n_layers - 1
        x = conv2d_relu(x, w_mats[idx], b_rows[idx], couts[idx],
                        out_dtype=jnp.float32 if last else jnp.bfloat16)
    x = jnp.transpose(x, (0, 3, 1, 2))      # NHWC -> NCHW for torch-style view
    return x.reshape(x.shape[0], -1)


# --------------------------- reference (plain JAX) -------------------------- #

def _reference_forward(obs_nchw, params):
    x = jnp.transpose(obs_nchw, (0, 2, 3, 1))
    for (w, b) in params:
        x = jax.lax.conv_general_dilated(
            x, w, window_strides=(2, 2), padding="VALID",
            dimension_numbers=("NHWC", "HWIO", "NHWC"))
        x = jnp.maximum(x + b, 0.0)
    x = jnp.transpose(x, (0, 3, 1, 2))
    return x.reshape(x.shape[0], -1)


# ---------------------------------- main ----------------------------------- #

if __name__ == "__main__":
    key = jax.random.PRNGKey(0)
    k_obs, k_params = jax.random.split(key)

    depth = 8          # small depth (PyTorch default is 32); same structure
    batch, H, W = 2, 64, 64
    obs = jax.random.normal(k_obs, (batch, 3, H, W), jnp.float32)

    params = init_conv_encoder_params(k_params, depth=depth)
    w_mats, b_rows, couts = prepare_params(params)

    out = conv_encoder_forward(obs, w_mats, b_rows, couts)
    out = jax.block_until_ready(out)

    # 64 -> 31 -> 14 -> 6 -> 2 spatial; final channels = 8*depth
    assert out.shape == (batch, 8 * depth * 2 * 2), out.shape

    # f32 reference; the kernel uses bf16 operands (f32 accumulation) over
    # four stacked layers, so compare with a bf16-appropriate tolerance.
    ref = jax.block_until_ready(_reference_forward(obs, params))
    assert jnp.allclose(out, ref, rtol=5e-2, atol=5e-2), \
        float(jnp.max(jnp.abs(out - ref)))

    print("KERNEL_OK")
</pallas_src>

<mosaic_0001>
module attributes {stable_mosaic.version = 11 : i64} {
  func.func @_matmul_bias_relu_kernel(%arg0: i32, %arg1: memref<512x48xbf16, #tpu.memory_space<vmem>>, %arg2: memref<48x128xbf16, #tpu.memory_space<vmem>>, %arg3: memref<1x128xf32, #tpu.memory_space<vmem>>, %arg4: memref<512x128xbf16, #tpu.memory_space<vmem>>) attributes {dimension_semantics = [#tpu.dimension_semantics<parallel>], iteration_bounds = array<i64: 4>, scalar_prefetch = 0 : i64, scratch_operands = 0 : i64, tpu.core_type = #tpu.core_type<tc>, window_params = [{transform_indices = @transform_0, window_bounds = array<i64: 512, 48>}, {pipeline_mode = #tpu.pipeline_mode<synchronous>, transform_indices = @transform_1, window_bounds = array<i64: 48, 128>}, {pipeline_mode = #tpu.pipeline_mode<synchronous>, transform_indices = @transform_2, window_bounds = array<i64: 1, 128>}, {transform_indices = @transform_3, window_bounds = array<i64: 512, 128>}]} {
    %c0 = arith.constant 0 : index
    %c0_0 = arith.constant 0 : index
    %0 = vector.load %arg1[%c0, %c0_0] : memref<512x48xbf16, #tpu.memory_space<vmem>>, vector<512x48xbf16>
    %c0_1 = arith.constant 0 : index
    %c0_2 = arith.constant 0 : index
    %1 = vector.load %arg2[%c0_1, %c0_2] : memref<48x128xbf16, #tpu.memory_space<vmem>>, vector<48x128xbf16>
    %cst = arith.constant dense<0.000000e+00> : vector<512x128xf32>
    %2 = tpu.matmul %0, %1, %cst {dimension_numbers = #tpu.dot_dimension_numbers<[1], [0], [0], [1], [0, 0, 1, 1], [], []>} : vector<512x48xbf16>, vector<48x128xbf16>, vector<512x128xf32> -> vector<512x128xf32>
    %c0_3 = arith.constant 0 : index
    %c0_4 = arith.constant 0 : index
    %3 = vector.load %arg3[%c0_3, %c0_4] : memref<1x128xf32, #tpu.memory_space<vmem>>, vector<1x128xf32>
    %4 = vector.broadcast %3 : vector<1x128xf32> to vector<512x128xf32>
    %5 = arith.addf %2, %4 : vector<512x128xf32>
    %cst_5 = arith.constant 0.000000e+00 : f32
    %6 = vector.broadcast %cst_5 : f32 to vector<512x128xf32>
    %7 = arith.maximumf %5, %6 : vector<512x128xf32>
    %8 = arith.truncf %7 : vector<512x128xf32> to vector<512x128xbf16>
    %c0_6 = arith.constant 0 : index
    %c0_7 = arith.constant 0 : index
    %9 = vector.load %arg4[%c0_6, %c0_7] : memref<512x128xbf16, #tpu.memory_space<vmem>>, vector<512x128xbf16>
    tpu.vector_store %arg4[%c0_6, %c0_7], %8 {strides = array<i32>} : memref<512x128xbf16, #tpu.memory_space<vmem>>, vector<512x128xbf16>,
    return
  }
  func.func @transform_0(%arg0: i32) -> (i32, i32) {
    %c0_i32 = arith.constant 0 : i32
    %c0_i32_0 = arith.constant 0 : i32
    return %arg0, %c0_i32 : i32, i32
  }
  func.func @transform_1(%arg0: i32) -> (i32, i32) {
    %c0_i32 = arith.constant 0 : i32
    %c0_i32_0 = arith.constant 0 : i32
    %c0_i32_1 = arith.constant 0 : i32
    return %c0_i32, %c0_i32_0 : i32, i32
  }
  func.func @transform_2(%arg0: i32) -> (i32, i32) {
    %c0_i32 = arith.constant 0 : i32
    %c0_i32_0 = arith.constant 0 : i32
    %c0_i32_1 = arith.constant 0 : i32
    return %c0_i32, %c0_i32_0 : i32, i32
  }
  func.func @transform_3(%arg0: i32) -> (i32, i32) {
    %c0_i32 = arith.constant 0 : i32
    %c0_i32_0 = arith.constant 0 : i32
    return %arg0, %c0_i32 : i32, i32
  }
}

module attributes {stable_mosaic.version = 11 : i64} {
  func.func @_matmul_bias_relu_kernel(%arg0: i32, %arg1: memref<392x128xbf16, #tpu.memory_space<vmem>>, %arg2: memref<128x128xbf16, #tpu.memory_space<vmem>>, %arg3: memref<1x128xf32, #tpu.memory_space<vmem>>, %arg4: memref<392x128xbf16, #tpu.memory_space<vmem>>) attributes {dimension_semantics = [#tpu.dimension_semantics<parallel>], iteration_bounds = array<i64: 1>, scalar_prefetch = 0 : i64, scratch_operands = 0 : i64, tpu.core_type = #tpu.core_type<tc>, window_params = [{transform_indices = @transform_0, window_bounds = array<i64: 392, 128>}, {pipeline_mode = #tpu.pipeline_mode<synchronous>, transform_indices = @transform_1, window_bounds = array<i64: 128, 128>}, {pipeline_mode = #tpu.pipeline_mode<synchronous>, transform_indices = @transform_2, window_bounds = array<i64: 1, 128>}, {transform_indices = @transform_3, window_bounds = array<i64: 392, 128>}]} {
    %c0 = arith.constant 0 : index
    %c0_0 = arith.constant 0 : index
    %0 = vector.load %arg1[%c0, %c0_0] : memref<392x128xbf16, #tpu.memory_space<vmem>>, vector<392x128xbf16>
    %c0_1 = arith.constant 0 : index
    %c0_2 = arith.constant 0 : index
    %1 = vector.load %arg2[%c0_1, %c0_2] : memref<128x128xbf16, #tpu.memory_space<vmem>>, vector<128x128xbf16>
    %cst = arith.constant dense<0.000000e+00> : vector<392x128xf32>
    %2 = tpu.matmul %0, %1, %cst {dimension_numbers = #tpu.dot_dimension_numbers<[1], [0], [0], [1], [0, 0, 1, 1], [], []>} : vector<392x128xbf16>, vector<128x128xbf16>, vector<392x128xf32> -> vector<392x128xf32>
    %c0_3 = arith.constant 0 : index
    %c0_4 = arith.constant 0 : index
    %3 = vector.load %arg3[%c0_3, %c0_4] : memref<1x128xf32, #tpu.memory_space<vmem>>, vector<1x128xf32>
    %4 = vector.broadcast %3 : vector<1x128xf32> to vector<392x128xf32>
    %5 = arith.addf %2, %4 : vector<392x128xf32>
    %cst_5 = arith.constant 0.000000e+00 : f32
    %6 = vector.broadcast %cst_5 : f32 to vector<392x128xf32>
    %7 = arith.maximumf %5, %6 : vector<392x128xf32>
    %8 = arith.truncf %7 : vector<392x128xf32> to vector<392x128xbf16>
    %c0_6 = arith.constant 0 : index
    %c0_7 = arith.constant 0 : index
    %9 = vector.load %arg4[%c0_6, %c0_7] : memref<392x128xbf16, #tpu.memory_space<vmem>>, vector<392x128xbf16>
    tpu.vector_store %arg4[%c0_6, %c0_7], %8 {strides = array<i32>} : memref<392x128xbf16, #tpu.memory_space<vmem>>, vector<392x128xbf16>,
    return
  }
  func.func @transform_0(%arg0: i32) -> (i32, i32) {
    %c0_i32 = arith.constant 0 : i32
    %c0_i32_0 = arith.constant 0 : i32
    return %arg0, %c0_i32 : i32, i32
  }
  func.func @transform_1(%arg0: i32) -> (i32, i32) {
    %c0_i32 = arith.constant 0 : i32
    %c0_i32_0 = arith.constant 0 : i32
    %c0_i32_1 = arith.constant 0 : i32
    return %c0_i32, %c0_i32_0 : i32, i32
  }
  func.func @transform_2(%arg0: i32) -> (i32, i32) {
    %c0_i32 = arith.constant 0 : i32
    %c0_i32_0 = arith.constant 0 : i32
    %c0_i32_1 = arith.constant 0 : i32
    return %c0_i32, %c0_i32_0 : i32, i32
  }
  func.func @transform_3(%arg0: i32) -> (i32, i32) {
    %c0_i32 = arith.constant 0 : i32
    %c0_i32_0 = arith.constant 0 : i32
    return %arg0, %c0_i32 : i32, i32
  }
}

module attributes {stable_mosaic.version = 11 : i64} {
  func.func @_matmul_bias_relu_kernel(%arg0: i32, %arg1: memref<72x256xbf16, #tpu.memory_space<vmem>>, %arg2: memref<256x128xbf16, #tpu.memory_space<vmem>>, %arg3: memref<1x128xf32, #tpu.memory_space<vmem>>, %arg4: memref<72x128xbf16, #tpu.memory_space<vmem>>) attributes {dimension_semantics = [#tpu.dimension_semantics<parallel>], iteration_bounds = array<i64: 1>, scalar_prefetch = 0 : i64, scratch_operands = 0 : i64, tpu.core_type = #tpu.core_type<tc>, window_params = [{transform_indices = @transform_0, window_bounds = array<i64: 72, 256>}, {pipeline_mode = #tpu.pipeline_mode<synchronous>, transform_indices = @transform_1, window_bounds = array<i64: 256, 128>}, {pipeline_mode = #tpu.pipeline_mode<synchronous>, transform_indices = @transform_2, window_bounds = array<i64: 1, 128>}, {transform_indices = @transform_3, window_bounds = array<i64: 72, 128>}]} {
    %c0 = arith.constant 0 : index
    %c0_0 = arith.constant 0 : index
    %0 = vector.load %arg1[%c0, %c0_0] : memref<72x256xbf16, #tpu.memory_space<vmem>>, vector<72x256xbf16>
    %c0_1 = arith.constant 0 : index
    %c0_2 = arith.constant 0 : index
    %1 = vector.load %arg2[%c0_1, %c0_2] : memref<256x128xbf16, #tpu.memory_space<vmem>>, vector<256x128xbf16>
    %cst = arith.constant dense<0.000000e+00> : vector<72x128xf32>
    %2 = tpu.matmul %0, %1, %cst {dimension_numbers = #tpu.dot_dimension_numbers<[1], [0], [0], [1], [0, 0, 1, 1], [], []>} : vector<72x256xbf16>, vector<256x128xbf16>, vector<72x128xf32> -> vector<72x128xf32>
    %c0_3 = arith.constant 0 : index
    %c0_4 = arith.constant 0 : index
    %3 = vector.load %arg3[%c0_3, %c0_4] : memref<1x128xf32, #tpu.memory_space<vmem>>, vector<1x128xf32>
    %4 = vector.broadcast %3 : vector<1x128xf32> to vector<72x128xf32>
    %5 = arith.addf %2, %4 : vector<72x128xf32>
    %cst_5 = arith.constant 0.000000e+00 : f32
    %6 = vector.broadcast %cst_5 : f32 to vector<72x128xf32>
    %7 = arith.maximumf %5, %6 : vector<72x128xf32>
    %8 = arith.truncf %7 : vector<72x128xf32> to vector<72x128xbf16>
    %c0_6 = arith.constant 0 : index
    %c0_7 = arith.constant 0 : index
    %9 = vector.load %arg4[%c0_6, %c0_7] : memref<72x128xbf16, #tpu.memory_space<vmem>>, vector<72x128xbf16>
    tpu.vector_store %arg4[%c0_6, %c0_7], %8 {strides = array<i32>} : memref<72x128xbf16, #tpu.memory_space<vmem>>, vector<72x128xbf16>,
    return
  }
  func.func @transform_0(%arg0: i32) -> (i32, i32) {
    %c0_i32 = arith.constant 0 : i32
    %c0_i32_0 = arith.constant 0 : i32
    return %arg0, %c0_i32 : i32, i32
  }
  func.func @transform_1(%arg0: i32) -> (i32, i32) {
    %c0_i32 = arith.constant 0 : i32
    %c0_i32_0 = arith.constant 0 : i32
    %c0_i32_1 = arith.constant 0 : i32
    return %c0_i32, %c0_i32_0 : i32, i32
  }
  func.func @transform_2(%arg0: i32) -> (i32, i32) {
    %c0_i32 = arith.constant 0 : i32
    %c0_i32_0 = arith.constant 0 : i32
    %c0_i32_1 = arith.constant 0 : i32
    return %c0_i32, %c0_i32_0 : i32, i32
  }
  func.func @transform_3(%arg0: i32) -> (i32, i32) {
    %c0_i32 = arith.constant 0 : i32
    %c0_i32_0 = arith.constant 0 : i32
    return %arg0, %c0_i32 : i32, i32
  }
}

module attributes {stable_mosaic.version = 11 : i64} {
  func.func @_matmul_bias_relu_kernel(%arg0: i32, %arg1: memref<8x512xbf16, #tpu.memory_space<vmem>>, %arg2: memref<512x128xbf16, #tpu.memory_space<vmem>>, %arg3: memref<1x128xf32, #tpu.memory_space<vmem>>, %arg4: memref<8x128xf32, #tpu.memory_space<vmem>>) attributes {dimension_semantics = [#tpu.dimension_semantics<parallel>], iteration_bounds = array<i64: 1>, scalar_prefetch = 0 : i64, scratch_operands = 0 : i64, tpu.core_type = #tpu.core_type<tc>, window_params = [{transform_indices = @transform_0, window_bounds = array<i64: 8, 512>}, {pipeline_mode = #tpu.pipeline_mode<synchronous>, transform_indices = @transform_1, window_bounds = array<i64: 512, 128>}, {pipeline_mode = #tpu.pipeline_mode<synchronous>, transform_indices = @transform_2, window_bounds = array<i64: 1, 128>}, {transform_indices = @transform_3, window_bounds = array<i64: 8, 128>}]} {
    %c0 = arith.constant 0 : index
    %c0_0 = arith.constant 0 : index
    %0 = vector.load %arg1[%c0, %c0_0] : memref<8x512xbf16, #tpu.memory_space<vmem>>, vector<8x512xbf16>
    %c0_1 = arith.constant 0 : index
    %c0_2 = arith.constant 0 : index
    %1 = vector.load %arg2[%c0_1, %c0_2] : memref<512x128xbf16, #tpu.memory_space<vmem>>, vector<512x128xbf16>
    %cst = arith.constant dense<0.000000e+00> : vector<8x128xf32>
    %2 = tpu.matmul %0, %1, %cst {dimension_numbers = #tpu.dot_dimension_numbers<[1], [0], [0], [1], [0, 0, 1, 1], [], []>} : vector<8x512xbf16>, vector<512x128xbf16>, vector<8x128xf32> -> vector<8x128xf32>
    %c0_3 = arith.constant 0 : index
    %c0_4 = arith.constant 0 : index
    %3 = vector.load %arg3[%c0_3, %c0_4] : memref<1x128xf32, #tpu.memory_space<vmem>>, vector<1x128xf32>
    %4 = vector.broadcast %3 : vector<1x128xf32> to vector<8x128xf32>
    %5 = arith.addf %2, %4 : vector<8x128xf32>
    %cst_5 = arith.constant 0.000000e+00 : f32
    %6 = vector.broadcast %cst_5 : f32 to vector<8x128xf32>
    %7 = arith.maximumf %5, %6 : vector<8x128xf32>
    %c0_6 = arith.constant 0 : index
    %c0_7 = arith.constant 0 : index
    %8 = vector.load %arg4[%c0_6, %c0_7] : memref<8x128xf32, #tpu.memory_space<vmem>>, vector<8x128xf32>
    tpu.vector_store %arg4[%c0_6, %c0_7], %7 {strides = array<i32>} : memref<8x128xf32, #tpu.memory_space<vmem>>, vector<8x128xf32>,
    return
  }
  func.func @transform_0(%arg0: i32) -> (i32, i32) {
    %c0_i32 = arith.constant 0 : i32
    %c0_i32_0 = arith.constant 0 : i32
    return %arg0, %c0_i32 : i32, i32
  }
  func.func @transform_1(%arg0: i32) -> (i32, i32) {
    %c0_i32 = arith.constant 0 : i32
    %c0_i32_0 = arith.constant 0 : i32
    %c0_i32_1 = arith.constant 0 : i32
    return %c0_i32, %c0_i32_0 : i32, i32
  }
  func.func @transform_2(%arg0: i32) -> (i32, i32) {
    %c0_i32 = arith.constant 0 : i32
    %c0_i32_0 = arith.constant 0 : i32
    %c0_i32_1 = arith.constant 0 : i32
    return %c0_i32, %c0_i32_0 : i32, i32
  }
  func.func @transform_3(%arg0: i32) -> (i32, i32) {
    %c0_i32 = arith.constant 0 : i32
    %c0_i32_0 = arith.constant 0 : i32
    return %arg0, %c0_i32 : i32, i32
  }
}

</mosaic_0001>

<bundles_post_ra>
// kernel: conv_encoder_forward.4
= control target key start
LH: loop header
LB: loop body
LE: loop exit
PB: predicated region body
PF: predicated region fallthrough
CT: control target
= control target key end

     0   :  { %s1874_s12 = smov 0   ;;  %s1876_s13 = smov 0   ;;  %s2232_s0 = inlined_call_operand.vmem [shape: bf16[1922,48], index: 0, kind: input, shape index: {}]   ;;  %s2233_s1 = inlined_call_operand.vmem [shape: bf16[48,128], index: 1, kind: input, shape index: {}]   ;;  %s2234_s2 = inlined_call_operand.vmem [shape: f32[1,128], index: 2, kind: input, shape index: {}]   ;;  %s2235_s3 = inlined_call_operand.vmem [shape: bf16[1922,128], index: 3, kind: output, shape index: {}]  }
   0x1   :  { %s1878_s14 = smov 0  }
   0x2 LB: > { %s1887_s15 = sadd.s32 4294967295, %s1820_s14   ;;  %s1889_s16 = sadd.s32 1, %s1820_s14   ;;  %s1820_s14 = sphi %s1878_s14, %s2244_s14   ;;  %s1816_s13 = sphi %s1876_s13, %s2243_s13   ;;  %s1812_s12 = sphi %s1874_s12, %s2242_s12  }
   0x3   : > { %s85_s17 = ssub.s32 %s1820_s14, %s1889_s16  ;;  %s88_s18 = sadd.s32 1, %s1816_s13 }
   0x4   : > { %p86_p0 = scmp.eq.s32.totalorder %s85_s17, 0  ;;  %p98_p1 = scmp.ne.s32.totalorder %s1816_s13, %s1812_s12 }
   0x5   : > { %p99_p2 = scmp.eq.s32.totalorder %s1887_s15, 3  ;;  %p1246_p3 = scmp.ge.s32.totalorder %s1820_s14, 1 }
   0x6   : > { %s1897_s19 = scalar_select %p86_p0, %s1816_s13, %s88_s18  }
   0x7   : > { %p1899_p4 = por %p99_p2, %p98_p1  ;;  %p146_p5 = scmp.lt.s32.totalorder %s1820_s14, 5 }
   0x9   : > { %p147_p6 = pnand %p1246_p3, %p146_p5 }
   0xa   : > { %s1907_s23 = sshll.u32 (!%p147_p6), %s1887_s15, 6  ;;  %s170_s8 = sand.u32 (!%p147_p6), 1, %s1812_s12  }
   0xb   : > { %150 = sbr.rel (%p147_p6) target bundleno = 353 (0x161), region = 32  ;;  %p178_p7 = scmp.lt.s32.totalorder (!%p147_p6), %s1907_s23, 240 }
   0xc   : > { %s1247_s9 = sshll.u32 (!%p147_p6), %s170_s8, 8 }
   0xd   : > { %s1998_s10 = scalar_lea.vmem (!%p147_p6), [#allocation2], %s1247_s9  }
  0x10   : > { %v1473_v0 = vld [vmem:[%s2233_s1 + $0x10] sm:$0xff]  ;;  %v1472_v1 = vld [vmem:[%s2233_s1 + $0x8] sm:$0xff]  ;;  %s179_s26 = scalar_select %p178_p7, %s1907_s23, 240  ;;  %v1471_v2 = vld [vmem:[%s2233_s1] sm:$0xff]  ;;  %vm445_vm0 = vcmask 392192  }
  0x11   : > { %547 = vmatpush.bf16.msra.mxu0 %v1473_v0  ;;  %1668 = vmatpush.bf16.msra.mxu1 %v1473_v0  ;;  %v1989_v37 = vld [vmem:[%s2234_s2] ss:$0 sm:$0xff]  ;;  %s911_s11 = ssub.s32 (%p1899_p4), 241, %s1907_s23  ;;  %s1474_s12 = sshll.u32 (%p1899_p4), %s1887_s15, 8 }
  0x12   : > { %1669 = vmatpush.bf16.msra.mxu2 %v1473_v0  ;;  %1670 = vmatpush.bf16.msra.mxu3 %v1473_v0  ;;  %s1249_s27 = sshll.u32 %s179_s26, 2  ;;  %p912_p8 = scmp.lt.s32.totalorder (%p1899_p4), %s911_s11, 64 }
  0x13   : > { %s1920_s5 = scalar_lea.vmem %s2232_s0, %s1249_s27  ;;  %s2097_s18 = scalar_lea.vmem (%p1899_p4), %s2235_s3, %s1474_s12  }
  0x14   : > { %v1439_v3 = vld [vmem:[%s1920_s5] sm:$0xff]  ;;  %v1440_v7 = vld [vmem:[%s1920_s5 + $0x8] sm:$0xff]  ;;  %v1441_v11 = vld [vmem:[%s1920_s5 + $0x10] sm:$0xff] }
  0x15   : > { %548 = vmatpush.bf16.msra.mxu0 %v1472_v1  ;;  %1671 = vmatpush.bf16.msra.mxu1 %v1472_v1  ;;  %v1447_v4 = vld [vmem:[%s1920_s5 + $0x40] sm:$0xff]  ;;  %v1448_v8 = vld [vmem:[%s1920_s5 + $0x48] sm:$0xff]  ;;  %v1449_v12 = vld [vmem:[%s1920_s5 + $0x50] sm:$0xff] }
  0x16   : > { %1672 = vmatpush.bf16.msra.mxu2 %v1472_v1  ;;  %1673 = vmatpush.bf16.msra.mxu3 %v1472_v1  ;;  %v1455_v5 = vld [vmem:[%s1920_s5 + $0x80] sm:$0xff]  ;;  %v1456_v9 = vld [vmem:[%s1920_s5 + $0x88] sm:$0xff]  ;;  %v1457_v13 = vld [vmem:[%s1920_s5 + $0x90] sm:$0xff] }
  0x17   : > { %v1463_v6 = vld [vmem:[%s1920_s5 + $0xc0] sm:$0xff]  ;;  %v1464_v10 = vld [vmem:[%s1920_s5 + $0xc8] sm:$0xff]  ;;  %v1465_v14 = vld [vmem:[%s1920_s5 + $0xd0] sm:$0xff] }
  0x18   : > { %v1442_v15 = vld [vmem:[%s1920_s5 + $0x18] sm:$0xff]  ;;  %v1443_v19 = vld [vmem:[%s1920_s5 + $0x20] sm:$0xff]  ;;  %v1444_v23 = vld [vmem:[%s1920_s5 + $0x28] sm:$0xff] }
  0x19   : > { %549 = vmatpush.bf16.msra.mxu0 %v1471_v2  ;;  %1674 = vmatpush.bf16.msra.mxu1 %v1471_v2  ;;  %v1450_v16 = vld [vmem:[%s1920_s5 + $0x58] sm:$0xff]  ;;  %v1451_v20 = vld [vmem:[%s1920_s5 + $0x60] sm:$0xff]  ;;  %v1452_v24 = vld [vmem:[%s1920_s5 + $0x68] sm:$0xff] }
  0x1a   : > { %1675 = vmatpush.bf16.msra.mxu2 %v1471_v2  ;;  %1676 = vmatpush.bf16.msra.mxu3 %v1471_v2  ;;  %v1458_v17 = vld [vmem:[%s1920_s5 + $0x98] sm:$0xff]  ;;  %v1459_v21 = vld [vmem:[%s1920_s5 + $0xa0] sm:$0xff]  ;;  %v1460_v25 = vld [vmem:[%s1920_s5 + $0xa8] sm:$0xff] }
  0x1b   : > { %v1466_v18 = vld [vmem:[%s1920_s5 + $0xd8] sm:$0xff]  ;;  %v1467_v22 = vld [vmem:[%s1920_s5 + $0xe0] sm:$0xff]  ;;  %v1468_v26 = vld [vmem:[%s1920_s5 + $0xe8] sm:$0xff] }
  0x1c   : > { %1390 = vmatmul.msk.bf16.vlgmr.msra.gmra.mxu0 %vm445_vm0, %v1439_v3  ;;  %1398 = vmatmul.msk.bf16.vlgmr.msra.gmra.mxu1 %vm445_vm0, %v1447_v4  ;;  %v1445_v27 = vld [vmem:[%s1920_s5 + $0x30] sm:$0xff]  ;;  %v1446_v31 = vld [vmem:[%s1920_s5 + $0x38] sm:$0xff] }
  0x1d   : > { %1406 = vmatmul.msk.bf16.vlgmr.msra.gmra.mxu2 %vm445_vm0, %v1455_v5  ;;  %1414 = vmatmul.msk.bf16.vlgmr.msra.gmra.mxu3 %vm445_vm0, %v1463_v6  ;;  %v1453_v28 = vld [vmem:[%s1920_s5 + $0x70] sm:$0xff]  ;;  %v1454_v32 = vld [vmem:[%s1920_s5 + $0x78] sm:$0xff] }
  0x1e   : > { %v1461_v29 = vld [vmem:[%s1920_s5 + $0xb0] sm:$0xff]  ;;  %v1462_v33 = vld [vmem:[%s1920_s5 + $0xb8] sm:$0xff] }
  0x1f   : > { %v1469_v30 = vld [vmem:[%s1920_s5 + $0xf0] sm:$0xff]  ;;  %v1470_v34 = vld [vmem:[%s1920_s5 + $0xf8] sm:$0xff] }
  0x2c   : > { %1391 = vmatmul.msk.bf16.gmra.mxu0 %vm445_vm0, %v1440_v7  ;;  %1399 = vmatmul.msk.bf16.gmra.mxu1 %vm445_vm0, %v1448_v8 }
  0x2d   : > { %1407 = vmatmul.msk.bf16.gmra.mxu2 %vm445_vm0, %v1456_v9  ;;  %1415 = vmatmul.msk.bf16.gmra.mxu3 %vm445_vm0, %v1464_v10 }
  0x3c   : > { %1392 = vmatmul.msk.bf16.gmra.mxu0 %vm445_vm0, %v1441_v11  ;;  %1400 = vmatmul.msk.bf16.gmra.mxu1 %vm445_vm0, %v1449_v12 }
  0x3d   : > { %1408 = vmatmul.msk.bf16.gmra.mxu2 %vm445_vm0, %v1457_v13  ;;  %1416 = vmatmul.msk.bf16.gmra.mxu3 %vm445_vm0, %v1465_v14 }
  0x4c   : > { %1393 = vmatmul.msk.bf16.gmra.mxu0 %vm445_vm0, %v1442_v15  ;;  %1401 = vmatmul.msk.bf16.gmra.mxu1 %vm445_vm0, %v1450_v16 }
  0x4d   : > { %1409 = vmatmul.msk.bf16.gmra.mxu2 %vm445_vm0, %v1458_v17  ;;  %1417 = vmatmul.msk.bf16.gmra.mxu3 %vm445_vm0, %v1466_v18 }
  0x5c   : > { %1394 = vmatmul.msk.bf16.gmra.mxu0 %vm445_vm0, %v1443_v19  ;;  %1402 = vmatmul.msk.bf16.gmra.mxu1 %vm445_vm0, %v1451_v20 }
  0x5d   : > { %1410 = vmatmul.msk.bf16.gmra.mxu2 %vm445_vm0, %v1459_v21  ;;  %1418 = vmatmul.msk.bf16.gmra.mxu3 %vm445_vm0, %v1467_v22 }
  0x6c   : > { %1395 = vmatmul.msk.bf16.gmra.mxu0 %vm445_vm0, %v1444_v23  ;;  %1403 = vmatmul.msk.bf16.gmra.mxu1 %vm445_vm0, %v1452_v24 }
  0x6d   : > { %1411 = vmatmul.msk.bf16.gmra.mxu2 %vm445_vm0, %v1460_v25  ;;  %1419 = vmatmul.msk.bf16.gmra.mxu3 %vm445_vm0, %v1468_v26 }
  0x7c   : > { %1396 = vmatmul.msk.bf16.gmra.mxu0 %vm445_vm0, %v1445_v27  ;;  %1404 = vmatmul.msk.bf16.gmra.mxu1 %vm445_vm0, %v1453_v28 }
  0x7d   : > { %1412 = vmatmul.msk.bf16.gmra.mxu2 %vm445_vm0, %v1461_v29  ;;  %1420 = vmatmul.msk.bf16.gmra.mxu3 %vm445_vm0, %v1469_v30 }
  0x8c   : > { %1397 = vmatmul.msk.bf16.gmra.mxu0 %vm445_vm0, %v1446_v31  ;;  %1405 = vmatmul.msk.bf16.gmra.mxu1 %vm445_vm0, %v1454_v32 }
  0x8d   : > { %1413 = vmatmul.msk.bf16.gmra.mxu2 %vm445_vm0, %v1462_v33  ;;  %1421 = vmatmul.msk.bf16.gmra.mxu3 %vm445_vm0, %v1470_v34 }
  0x99   : > { %v551_v35 = vpop.f32.mrf.mxu0  ;;  %v591_v36 = vpop.f32.mrf.mxu1 }
  0x9a   : > { %v552_v38 = vadd.f32 %v1989_v37, %v551_v35  ;;  %v592_v39 = vadd.f32 %v1989_v37, %v591_v36 }
  0x9c   : > { %v711_v46 = vmax.f32 %v552_v38, 0.0  ;;  %v727_v47 = vmax.f32 %v592_v39, 0.0 }
  0xa0   : > { %v631_v40 = vpop.f32.mrf.mxu2  ;;  %v671_v41 = vpop.f32.mrf.mxu3 }
  0xa1   : > { %v553_v42 = vpop.f32.mrf.mxu0  ;;  %v593_v43 = vpop.f32.mrf.mxu1  ;;  %v632_v52 = vadd.f32 %v1989_v37, %v631_v40  ;;  %v672_v53 = vadd.f32 %v1989_v37, %v671_v41 }
  0xa2   : > { %v554_v44 = vadd.f32 %v1989_v37, %v553_v42  ;;  %v594_v45 = vadd.f32 %v1989_v37, %v593_v43 }
  0xa3   : > { %v743_v60 = vmax.f32 %v632_v52, 0.0  ;;  %v759_v61 = vmax.f32 %v672_v53, 0.0 }
  0xa4   : > { %v712_v48 = vmax.f32 %v554_v44, 0.0  ;;  %v728_v49 = vmax.f32 %v594_v45, 0.0 }
  0xa6   : > { %v1480_v50 = vpack.c.bf16 %v712_v48, %v711_v46  ;;  %v1520_v51 = vpack.c.bf16 %v728_v49, %v727_v47 }
  0xa8   : > { %1481 = vst [vmem:[%s1998_s10] sm:$0xff] %v1480_v50   ;;  %v633_v54 = vpop.f32.mrf.mxu2  ;;  %v673_v55 = vpop.f32.mrf.mxu3 }
  0xa9   : > { %1644 = vst [vmem:[%s1998_s10 + $0x40] sm:$0xff] %v1520_v51   ;;  %v634_v56 = vadd.f32 %v1989_v37, %v633_v54  ;;  %v674_v57 = vadd.f32 %v1989_v37, %v673_v55  ;;  %v556_v58 = vpop.f32.mrf.mxu0  ;;  %v596_v59 = vpop.f32.mrf.mxu1 }
  0xaa   : > { %v557_v2 = vadd.f32 %v1989_v37, %v556_v58  ;;  %v597_v3 = vadd.f32 %v1989_v37, %v596_v59 }
  0xab   : > { %v744_v62 = vmax.f32 %v634_v56, 0.0  ;;  %v760_v63 = vmax.f32 %v674_v57, 0.0 }
  0xac   : > { %v713_v10 = vmax.f32 %v557_v2, 0.0  ;;  %v729_v11 = vmax.f32 %v597_v3, 0.0 }
  0xad   : > { %v1560_v0 = vpack.c.bf16 %v744_v62, %v743_v60  ;;  %v1600_v1 = vpack.c.bf16 %v760_v63, %v759_v61 }
  0xaf   : > { %1652 = vst [vmem:[%s1998_s10 + $0x80] sm:$0xff] %v1560_v0  }
  0xb0   : > { %1660 = vst [vmem:[%s1998_s10 + $0xc0] sm:$0xff] %v1600_v1   ;;  %v636_v4 = vpop.f32.mrf.mxu2  ;;  %v676_v5 = vpop.f32.mrf.mxu3 }
  0xb1   : > { %v558_v6 = vpop.f32.mrf.mxu0  ;;  %v598_v7 = vpop.f32.mrf.mxu1  ;;  %v637_v16 = vadd.f32 %v1989_v37, %v636_v4  ;;  %v677_v17 = vadd.f32 %v1989_v37, %v676_v5 }
  0xb2   : > { %v559_v8 = vadd.f32 %v1989_v37, %v558_v6  ;;  %v599_v9 = vadd.f32 %v1989_v37, %v598_v7 }
  0xb3   : > { %v745_v24 = vmax.f32 %v637_v16, 0.0  ;;  %v761_v25 = vmax.f32 %v677_v17, 0.0 }
  0xb4   : > { %v714_v12 = vmax.f32 %v559_v8, 0.0  ;;  %v730_v13 = vmax.f32 %v599_v9, 0.0 }
  0xb6   : > { %v1485_v14 = vpack.c.bf16 %v714_v12, %v713_v10  ;;  %v1525_v15 = vpack.c.bf16 %v730_v13, %v729_v11 }
  0xb8   : > { %1637 = vst [vmem:[%s1998_s10 + $0x8] sm:$0xff] %v1485_v14   ;;  %v638_v18 = vpop.f32.mrf.mxu2  ;;  %v678_v19 = vpop.f32.mrf.mxu3 }
  0xb9   : > { %1645 = vst [vmem:[%s1998_s10 + $0x48] sm:$0xff] %v1525_v15   ;;  %v639_v20 = vadd.f32 %v1989_v37, %v638_v18  ;;  %v679_v21 = vadd.f32 %v1989_v37, %v678_v19  ;;  %v561_v22 = vpop.f32.mrf.mxu0  ;;  %v601_v23 = vpop.f32.mrf.mxu1 }
  0xba   : > { %v562_v30 = vadd.f32 %v1989_v37, %v561_v22  ;;  %v602_v31 = vadd.f32 %v1989_v37, %v601_v23 }
  0xbb   : > { %v746_v26 = vmax.f32 %v639_v20, 0.0  ;;  %v762_v27 = vmax.f32 %v679_v21, 0.0 }
  0xbc   : > { %v715_v39 = vmax.f32 %v562_v30, 0.0  ;;  %v731_v40 = vmax.f32 %v602_v31, 0.0 }
  0xbd   : > { %v1565_v28 = vpack.c.bf16 %v746_v26, %v745_v24  ;;  %v1605_v29 = vpack.c.bf16 %v762_v27, %v761_v25 }
  0xbf   : > { %1653 = vst [vmem:[%s1998_s10 + $0x88] sm:$0xff] %v1565_v28  }
  0xc0   : > { %1661 = vst [vmem:[%s1998_s10 + $0xc8] sm:$0xff] %v1605_v29   ;;  %v641_v32 = vpop.f32.mrf.mxu2  ;;  %v681_v33 = vpop.f32.mrf.mxu3 }
  0xc1   : > { %v563_v34 = vpop.f32.mrf.mxu0  ;;  %v603_v35 = vpop.f32.mrf.mxu1  ;;  %v642_v45 = vadd.f32 %v1989_v37, %v641_v32  ;;  %v682_v46 = vadd.f32 %v1989_v37, %v681_v33 }
  0xc2   : > { %v564_v36 = vadd.f32 %v1989_v37, %v563_v34  ;;  %v604_v38 = vadd.f32 %v1989_v37, %v603_v35 }
  0xc3   : > { %v747_v53 = vmax.f32 %v642_v45, 0.0  ;;  %v763_v54 = vmax.f32 %v682_v46, 0.0 }
  0xc4   : > { %v716_v41 = vmax.f32 %v564_v36, 0.0  ;;  %v732_v42 = vmax.f32 %v604_v38, 0.0 }
  0xc6   : > { %v1490_v43 = vpack.c.bf16 %v716_v41, %v715_v39  ;;  %v1530_v44 = vpack.c.bf16 %v732_v42, %v731_v40 }
  0xc8   : > { %1638 = vst [vmem:[%s1998_s10 + $0x10] sm:$0xff] %v1490_v43   ;;  %v643_v47 = vpop.f32.mrf.mxu2  ;;  %v683_v48 = vpop.f32.mrf.mxu3 }
  0xc9   : > { %1646 = vst [vmem:[%s1998_s10 + $0x50] sm:$0xff] %v1530_v44   ;;  %v644_v49 = vadd.f32 %v1989_v37, %v643_v47  ;;  %v684_v50 = vadd.f32 %v1989_v37, %v683_v48  ;;  %v566_v51 = vpop.f32.mrf.mxu0  ;;  %v606_v52 = vpop.f32.mrf.mxu1 }
  0xca   : > { %v567_v59 = vadd.f32 %v1989_v37, %v566_v51  ;;  %v607_v60 = vadd.f32 %v1989_v37, %v606_v52 }
  0xcb   : > { %v748_v55 = vmax.f32 %v644_v49, 0.0  ;;  %v764_v56 = vmax.f32 %v684_v50, 0.0 }
  0xcc   : > { %v717_v3 = vmax.f32 %v567_v59, 0.0  ;;  %v733_v4 = vmax.f32 %v607_v60, 0.0 }
  0xcd   : > { %v1570_v57 = vpack.c.bf16 %v748_v55, %v747_v53  ;;  %v1610_v58 = vpack.c.bf16 %v764_v56, %v763_v54 }
  0xcf   : > { %1654 = vst [vmem:[%s1998_s10 + $0x90] sm:$0xff] %v1570_v57  }
  0xd0   : > { %1662 = vst [vmem:[%s1998_s10 + $0xd0] sm:$0xff] %v1610_v58   ;;  %v646_v61 = vpop.f32.mrf.mxu2  ;;  %v686_v62 = vpop.f32.mrf.mxu3 }
  0xd1   : > { %v568_v63 = vpop.f32.mrf.mxu0  ;;  %v608_v0 = vpop.f32.mrf.mxu1  ;;  %v647_v9 = vadd.f32 %v1989_v37, %v646_v61  ;;  %v687_v10 = vadd.f32 %v1989_v37, %v686_v62 }
  0xd2   : > { %v569_v1 = vadd.f32 %v1989_v37, %v568_v63  ;;  %v609_v2 = vadd.f32 %v1989_v37, %v608_v0 }
  0xd3   : > { %v749_v17 = vmax.f32 %v647_v9, 0.0  ;;  %v765_v18 = vmax.f32 %v687_v10, 0.0 }
  0xd4   : > { %v718_v5 = vmax.f32 %v569_v1, 0.0  ;;  %v734_v6 = vmax.f32 %v609_v2, 0.0 }
  0xd6   : > { %v1495_v7 = vpack.c.bf16 %v718_v5, %v717_v3  ;;  %v1535_v8 = vpack.c.bf16 %v734_v6, %v733_v4 }
  0xd8   : > { %1639 = vst [vmem:[%s1998_s10 + $0x18] sm:$0xff] %v1495_v7   ;;  %v648_v11 = vpop.f32.mrf.mxu2  ;;  %v688_v12 = vpop.f32.mrf.mxu3 }
  0xd9   : > { %1647 = vst [vmem:[%s1998_s10 + $0x58] sm:$0xff] %v1535_v8   ;;  %v649_v13 = vadd.f32 %v1989_v37, %v648_v11  ;;  %v689_v14 = vadd.f32 %v1989_v37, %v688_v12  ;;  %v571_v15 = vpop.f32.mrf.mxu0  ;;  %v611_v16 = vpop.f32.mrf.mxu1 }
  0xda   : > { %v572_v23 = vadd.f32 %v1989_v37, %v571_v15  ;;  %v612_v24 = vadd.f32 %v1989_v37, %v611_v16 }
  0xdb   : > { %v750_v19 = vmax.f32 %v649_v13, 0.0  ;;  %v766_v20 = vmax.f32 %v689_v14, 0.0 }
  0xdc   : > { %v719_v31 = vmax.f32 %v572_v23, 0.0  ;;  %v735_v32 = vmax.f32 %v612_v24, 0.0 }
  0xdd   : > { %v1575_v21 = vpack.c.bf16 %v750_v19, %v749_v17  ;;  %v1615_v22 = vpack.c.bf16 %v766_v20, %v765_v18 }
  0xdf   : > { %1655 = vst [vmem:[%s1998_s10 + $0x98] sm:$0xff] %v1575_v21  }
  0xe0   : > { %1663 = vst [vmem:[%s1998_s10 + $0xd8] sm:$0xff] %v1615_v22   ;;  %v651_v25 = vpop.f32.mrf.mxu2  ;;  %v691_v26 = vpop.f32.mrf.mxu3 }
  0xe1   : > { %v573_v27 = vpop.f32.mrf.mxu0  ;;  %v613_v28 = vpop.f32.mrf.mxu1  ;;  %v652_v38 = vadd.f32 %v1989_v37, %v651_v25  ;;  %v692_v39 = vadd.f32 %v1989_v37, %v691_v26 }
  0xe2   : > { %v574_v29 = vadd.f32 %v1989_v37, %v573_v27  ;;  %v614_v30 = vadd.f32 %v1989_v37, %v613_v28 }
  0xe3   : > { %v751_v46 = vmax.f32 %v652_v38, 0.0  ;;  %v767_v47 = vmax.f32 %v692_v39, 0.0 }
  0xe4   : > { %v720_v33 = vmax.f32 %v574_v29, 0.0  ;;  %v736_v34 = vmax.f32 %v614_v30, 0.0 }
  0xe6   : > { %v1500_v35 = vpack.c.bf16 %v720_v33, %v719_v31  ;;  %v1540_v36 = vpack.c.bf16 %v736_v34, %v735_v32 }
  0xe8   : > { %1640 = vst [vmem:[%s1998_s10 + $0x20] sm:$0xff] %v1500_v35   ;;  %v653_v40 = vpop.f32.mrf.mxu2  ;;  %v693_v41 = vpop.f32.mrf.mxu3 }
  0xe9   : > { %1648 = vst [vmem:[%s1998_s10 + $0x60] sm:$0xff] %v1540_v36   ;;  %v654_v42 = vadd.f32 %v1989_v37, %v653_v40  ;;  %v694_v43 = vadd.f32 %v1989_v37, %v693_v41  ;;  %v576_v44 = vpop.f32.mrf.mxu0  ;;  %v616_v45 = vpop.f32.mrf.mxu1 }
  0xea   : > { %v577_v52 = vadd.f32 %v1989_v37, %v576_v44  ;;  %v617_v53 = vadd.f32 %v1989_v37, %v616_v45 }
  0xeb   : > { %v752_v48 = vmax.f32 %v654_v42, 0.0  ;;  %v768_v49 = vmax.f32 %v694_v43, 0.0 }
  0xec   : > { %v721_v60 = vmax.f32 %v577_v52, 0.0  ;;  %v737_v61 = vmax.f32 %v617_v53, 0.0 }
  0xed   : > { %v1580_v50 = vpack.c.bf16 %v752_v48, %v751_v46  ;;  %v1620_v51 = vpack.c.bf16 %v768_v49, %v767_v47 }
  0xef   : > { %1656 = vst [vmem:[%s1998_s10 + $0xa0] sm:$0xff] %v1580_v50  }
  0xf0   : > { %1664 = vst [vmem:[%s1998_s10 + $0xe0] sm:$0xff] %v1620_v51   ;;  %v656_v54 = vpop.f32.mrf.mxu2  ;;  %v696_v55 = vpop.f32.mrf.mxu3 }
  0xf1   : > { %v578_v56 = vpop.f32.mrf.mxu0  ;;  %v618_v57 = vpop.f32.mrf.mxu1  ;;  %v657_v2 = vadd.f32 %v1989_v37, %v656_v54  ;;  %v697_v3 = vadd.f32 %v1989_v37, %v696_v55 }
  0xf2   : > { %v579_v58 = vadd.f32 %v1989_v37, %v578_v56  ;;  %v619_v59 = vadd.f32 %v1989_v37, %v618_v57 }
  0xf3   : > { %v753_v10 = vmax.f32 %v657_v2, 0.0  ;;  %v769_v11 = vmax.f32 %v697_v3, 0.0 }
  0xf4   : > { %v722_v62 = vmax.f32 %v579_v58, 0.0  ;;  %v738_v63 = vmax.f32 %v619_v59, 0.0 }
  0xf6   : > { %v1505_v0 = vpack.c.bf16 %v722_v62, %v721_v60  ;;  %v1545_v1 = vpack.c.bf16 %v738_v63, %v737_v61 }
  0xf8   : > { %1641 = vst [vmem:[%s1998_s10 + $0x28] sm:$0xff] %v1505_v0   ;;  %v658_v4 = vpop.f32.mrf.mxu2  ;;  %v698_v5 = vpop.f32.mrf.mxu3 }
  0xf9   : > { %1649 = vst [vmem:[%s1998_s10 + $0x68] sm:$0xff] %v1545_v1   ;;  %v659_v6 = vadd.f32 %v1989_v37, %v658_v4  ;;  %v699_v7 = vadd.f32 %v1989_v37, %v698_v5  ;;  %v581_v8 = vpop.f32.mrf.mxu0  ;;  %v621_v9 = vpop.f32.mrf.mxu1 }
  0xfa   : > { %v582_v16 = vadd.f32 %v1989_v37, %v581_v8  ;;  %v622_v17 = vadd.f32 %v1989_v37, %v621_v9 }
  0xfb   : > { %v754_v12 = vmax.f32 %v659_v6, 0.0  ;;  %v770_v13 = vmax.f32 %v699_v7, 0.0 }
  0xfc   : > { %v723_v24 = vmax.f32 %v582_v16, 0.0  ;;  %v739_v25 = vmax.f32 %v622_v17, 0.0 }
  0xfd   : > { %v1585_v14 = vpack.c.bf16 %v754_v12, %v753_v10  ;;  %v1625_v15 = vpack.c.bf16 %v770_v13, %v769_v11 }
  0xff   : > { %1657 = vst [vmem:[%s1998_s10 + $0xa8] sm:$0xff] %v1585_v14  }
 0x100   : > { %1665 = vst [vmem:[%s1998_s10 + $0xe8] sm:$0xff] %v1625_v15   ;;  %v661_v18 = vpop.f32.mrf.mxu2  ;;  %v701_v19 = vpop.f32.mrf.mxu3 }
 0x101   : > { %v583_v20 = vpop.f32.mrf.mxu0  ;;  %v623_v21 = vpop.f32.mrf.mxu1  ;;  %v662_v30 = vadd.f32 %v1989_v37, %v661_v18  ;;  %v702_v31 = vadd.f32 %v1989_v37, %v701_v19 }
 0x102   : > { %v584_v22 = vadd.f32 %v1989_v37, %v583_v20  ;;  %v624_v23 = vadd.f32 %v1989_v37, %v623_v21 }
 0x103   : > { %v755_v39 = vmax.f32 %v662_v30, 0.0  ;;  %v771_v40 = vmax.f32 %v702_v31, 0.0 }
 0x104   : > { %v724_v26 = vmax.f32 %v584_v22, 0.0  ;;  %v740_v27 = vmax.f32 %v624_v23, 0.0 }
 0x106   : > { %v1510_v28 = vpack.c.bf16 %v724_v26, %v723_v24  ;;  %v1550_v29 = vpack.c.bf16 %v740_v27, %v739_v25 }
 0x108   : > { %1642 = vst [vmem:[%s1998_s10 + $0x30] sm:$0xff] %v1510_v28   ;;  %v663_v32 = vpop.f32.mrf.mxu2  ;;  %v703_v33 = vpop.f32.mrf.mxu3 }
 0x109   : > { %1650 = vst [vmem:[%s1998_s10 + $0x70] sm:$0xff] %v1550_v29   ;;  %v664_v34 = vadd.f32 %v1989_v37, %v663_v32  ;;  %v704_v35 = vadd.f32 %v1989_v37, %v703_v33  ;;  %v586_v36 = vpop.f32.mrf.mxu0  ;;  %v626_v38 = vpop.f32.mrf.mxu1 }
 0x10a   : > { %v587_v45 = vadd.f32 %v1989_v37, %v586_v36  ;;  %v627_v46 = vadd.f32 %v1989_v37, %v626_v38 }
 0x10b   : > { %v756_v41 = vmax.f32 %v664_v34, 0.0  ;;  %v772_v42 = vmax.f32 %v704_v35, 0.0 }
 0x10c   : > { %v725_v53 = vmax.f32 %v587_v45, 0.0  ;;  %v741_v54 = vmax.f32 %v627_v46, 0.0 }
 0x10d   : > { %v1590_v43 = vpack.c.bf16 %v756_v41, %v755_v39  ;;  %v1630_v44 = vpack.c.bf16 %v772_v42, %v771_v40 }
 0x10f   : > { %1658 = vst [vmem:[%s1998_s10 + $0xb0] sm:$0xff] %v1590_v43  }
 0x110   : > { %1666 = vst [vmem:[%s1998_s10 + $0xf0] sm:$0xff] %v1630_v44   ;;  %v666_v47 = vpop.f32.mrf.mxu2  ;;  %v706_v48 = vpop.f32.mrf.mxu3 }
 0x111   : > { %v588_v49 = vpop.f32.mrf.mxu0  ;;  %v628_v50 = vpop.f32.mrf.mxu1  ;;  %v667_v59 = vadd.f32 %v1989_v37, %v666_v47  ;;  %v707_v60 = vadd.f32 %v1989_v37, %v706_v48 }
 0x112   : > { %v589_v51 = vadd.f32 %v1989_v37, %v588_v49  ;;  %v629_v52 = vadd.f32 %v1989_v37, %v628_v50 }
 0x113   : > { %v757_v1 = vmax.f32 %v667_v59, 0.0  ;;  %v773_v2 = vmax.f32 %v707_v60, 0.0 }
 0x114   : > { %v726_v55 = vmax.f32 %v589_v51, 0.0  ;;  %v742_v56 = vmax.f32 %v629_v52, 0.0 }
 0x116   : > { %v1515_v57 = vpack.c.bf16 %v726_v55, %v725_v53  ;;  %v1555_v58 = vpack.c.bf16 %v742_v56, %v741_v54 }
 0x118   : > { %1643 = vst [vmem:[%s1998_s10 + $0x38] sm:$0xff] %v1515_v57   ;;  %v668_v61 = vpop.f32.mrf.mxu2  ;;  %v708_v62 = vpop.f32.mrf.mxu3 }
 0x119   : > { %1651 = vst [vmem:[%s1998_s10 + $0x78] sm:$0xff] %v1555_v58   ;;  %v669_v63 = vadd.f32 %v1989_v37, %v668_v61  ;;  %v709_v0 = vadd.f32 %v1989_v37, %v708_v62 }
 0x11b   : > { %v758_v3 = vmax.f32 %v669_v63, 0.0  ;;  %v774_v4 = vmax.f32 %v709_v0, 0.0 }
 0x11c   : > { %909 = sbr.rel (!%p1899_p4) target bundleno = 353 (0x161), region = 36 }
 0x11d   : > { %v1595_v5 = vpack.c.bf16 %v758_v3, %v757_v1  ;;  %v1635_v6 = vpack.c.bf16 %v774_v4, %v773_v2 }
 0x11f   : > { %1659 = vst [vmem:[%s1998_s10 + $0xb8] sm:$0xff] %v1595_v5  }
 0x120   : > { %1667 = vst [vmem:[%s1998_s10 + $0xf8] sm:$0xff] %v1635_v6  }
 0x121   : > { %s2246_s11 = smov (!%p912_p8, %s911_s11), 64 }
 0x122   : > { %s1424_s21 = sshll.u32 %s2246_s11, 2 }
 0x123   : > { %p1427_p9 = scmp.eq.s32.totalorder %s1424_s21, 0 }
 0x124   : > { %s2103_s22 = sshrl.u32 (!%p1427_p9), %s2246_s11, 5 }
 0x125   : > { %920 = sbr.rel (%p1427_p9) target bundleno = 353 (0x161), region = 40  ;;  %p1428_p10 = scmp.le.s32.totalorder (!%p1427_p9), %s2103_s22, 0 }
 0x12a   : > { %1199 = sbr.rel (%p1428_p10) target bundleno = 336 (0x150), region = 112  ;;  %s2237_s15 = smov (!%p1428_p10), %s2097_s18 }
 0x12b   : > { %s2238_s20 = smov (!%p1428_p10), %s1998_s10  ;;  %s2112_s23 = smov (!%p1428_p10), 0  }
 0x12c   : > { %s2114_s24 = smov (!%p1428_p10), 0  }
 0x12f LB: >> { %v937_v37 = vld [vmem:[%s1828_s20] sm:$0xf]  ;;  %v939_v7 = vld [vmem:[%s1828_s20 + $0x4] sm:$0xf]  ;;  %v941_v8 = vld [vmem:[%s1828_s20 + $0x8] sm:$0xf]  ;;  %s1836_s24 = sphi %s2114_s24, %s931_s24   ;;  %s1832_s23 = sphi %s2112_s23, %s2241_s23   ;;  %s1828_s20 = sphi %s2238_s20, %s2240_s20   ;;  %s1824_s15 = sphi %s2237_s15, %s2239_s15  }
 0x130   : >> { %938 = vst [vmem:[%s1824_s15] sm:$0xf] %v937_v37  ;;  %v943_v9 = vld [vmem:[%s1828_s20 + $0xc] sm:$0xf]  ;;  %v945_v10 = vld [vmem:[%s1828_s20 + $0x10] sm:$0xf]  ;;  %s1001_s25 = sadd.s32 1, %s1832_s23 }
 0x131   : >> { %940 = vst [vmem:[%s1824_s15 + $0x4] sm:$0xf] %v939_v7  ;;  %v947_v11 = vld [vmem:[%s1828_s20 + $0x14] sm:$0xf]  ;;  %v949_v12 = vld [vmem:[%s1828_s20 + $0x18] sm:$0xf]  ;;  %p1002_p11 = scmp.ge.s32.totalorder %s1001_s25, %s2103_s22 }
 0x132   : >> { %942 = vst [vmem:[%s1824_s15 + $0x8] sm:$0xf] %v941_v8  ;;  %v951_v13 = vld [vmem:[%s1828_s20 + $0x1c] sm:$0xf]  ;;  %v953_v14 = vld [vmem:[%s1828_s20 + $0x20] sm:$0xf] }
 0x133   : >> { %944 = vst [vmem:[%s1824_s15 + $0xc] sm:$0xf] %v943_v9  ;;  %v955_v15 = vld [vmem:[%s1828_s20 + $0x24] sm:$0xf]  ;;  %v957_v16 = vld [vmem:[%s1828_s20 + $0x28] sm:$0xf] }
 0x134   : >> { %946 = vst [vmem:[%s1824_s15 + $0x10] sm:$0xf] %v945_v10  ;;  %v959_v17 = vld [vmem:[%s1828_s20 + $0x2c] sm:$0xf]  ;;  %v961_v18 = vld [vmem:[%s1828_s20 + $0x30] sm:$0xf] }
 0x135   : >> { %948 = vst [vmem:[%s1824_s15 + $0x14] sm:$0xf] %v947_v11  ;;  %v963_v19 = vld [vmem:[%s1828_s20 + $0x34] sm:$0xf]  ;;  %v965_v20 = vld [vmem:[%s1828_s20 + $0x38] sm:$0xf] }
 0x136   : >> { %950 = vst [vmem:[%s1824_s15 + $0x18] sm:$0xf] %v949_v12  ;;  %v967_v21 = vld [vmem:[%s1828_s20 + $0x3c] sm:$0xf]  ;;  %v969_v22 = vld [vmem:[%s1828_s20 + $0x40] sm:$0xf] }
 0x137   : >> { %952 = vst [vmem:[%s1824_s15 + $0x1c] sm:$0xf] %v951_v13  ;;  %v971_v23 = vld [vmem:[%s1828_s20 + $0x44] sm:$0xf]  ;;  %s2248_s25 = smov (%p1002_p11, %s1001_s25), 0  ;;  %s931_s24 = sadd.s32 1, %s1836_s24  }
 0x138   : >> { %954 = vst [vmem:[%s1824_s15 + $0x20] sm:$0xf] %v953_v14  ;;  %v973_v24 = vld [vmem:[%s1828_s20 + $0x48] sm:$0xf]  ;;  %v975_v25 = vld [vmem:[%s1828_s20 + $0x4c] sm:$0xf]  ;;  %p930_p12 = scmp.ge.s32.totalorder %s931_s24, %s2103_s22  ;;  %s2241_s23 = smov %s2248_s25 }
 0x139   : >> { %956 = vst [vmem:[%s1824_s15 + $0x24] sm:$0xf] %v955_v15  ;;  %s1429_s26 = sshll.u32 %s2248_s25, 7  ;;  %v977_v26 = vld [vmem:[%s1828_s20 + $0x50] sm:$0xf] }
 0x13a   : >> { %958 = vst [vmem:[%s1824_s15 + $0x28] sm:$0xf] %v957_v16  ;;  %s2173_s27 = scalar_lea.vmem %s1998_s10, %s1429_s26 [#allocation2]   ;;  %s1007_s28 = scalar_lea.vmem %s2097_s18, %s1429_s26   ;;  %v979_v27 = vld [vmem:[%s1828_s20 + $0x54] sm:$0xf]  ;;  %v981_v28 = vld [vmem:[%s1828_s20 + $0x58] sm:$0xf] }
 0x13b   : >> { %960 = vst [vmem:[%s1824_s15 + $0x2c] sm:$0xf] %v959_v17  ;;  %v983_v29 = vld [vmem:[%s1828_s20 + $0x5c] sm:$0xf]  ;;  %v985_v30 = vld [vmem:[%s1828_s20 + $0x60] sm:$0xf] }
 0x13c   : >> { %962 = vst [vmem:[%s1824_s15 + $0x30] sm:$0xf] %v961_v18  ;;  %v987_v31 = vld [vmem:[%s1828_s20 + $0x64] sm:$0xf]  ;;  %v989_v32 = vld [vmem:[%s1828_s20 + $0x68] sm:$0xf] }
 0x13d   : >> { %964 = vst [vmem:[%s1824_s15 + $0x34] sm:$0xf] %v963_v19  ;;  %v991_v33 = vld [vmem:[%s1828_s20 + $0x6c] sm:$0xf]  ;;  %v993_v34 = vld [vmem:[%s1828_s20 + $0x70] sm:$0xf] }
 0x13e   : >> { %966 = vst [vmem:[%s1824_s15 + $0x38] sm:$0xf] %v965_v20  ;;  %v995_v35 = vld [vmem:[%s1828_s20 + $0x74] sm:$0xf]  ;;  %v997_v36 = vld [vmem:[%s1828_s20 + $0x78] sm:$0xf] }
 0x13f   : >> { %968 = vst [vmem:[%s1824_s15 + $0x3c] sm:$0xf] %v967_v21  ;;  %v999_v38 = vld [vmem:[%s1828_s20 + $0x7c] sm:$0xf]  ;;  %s2240_s20 = smov %s2173_s27 }
 0x140   : >> { %970 = vst [vmem:[%s1824_s15 + $0x40] sm:$0xf] %v969_v22 }
 0x141   : >> { %972 = vst [vmem:[%s1824_s15 + $0x44] sm:$0xf] %v971_v23 }
 0x142   : >> { %974 = vst [vmem:[%s1824_s15 + $0x48] sm:$0xf] %v973_v24 }
 0x143   : >> { %976 = vst [vmem:[%s1824_s15 + $0x4c] sm:$0xf] %v975_v25 }
 0x144   : >> { %978 = vst [vmem:[%s1824_s15 + $0x50] sm:$0xf] %v977_v26 }
 0x145   : >> { %980 = vst [vmem:[%s1824_s15 + $0x54] sm:$0xf] %v979_v27 }
 0x146   : >> { %982 = vst [vmem:[%s1824_s15 + $0x58] sm:$0xf] %v981_v28 }
 0x147   : >> { %984 = vst [vmem:[%s1824_s15 + $0x5c] sm:$0xf] %v983_v29 }
 0x148   : >> { %986 = vst [vmem:[%s1824_s15 + $0x60] sm:$0xf] %v985_v30 }
 0x149   : >> { %988 = vst [vmem:[%s1824_s15 + $0x64] sm:$0xf] %v987_v31 }
 0x14a   : >> { %990 = vst [vmem:[%s1824_s15 + $0x68] sm:$0xf] %v989_v32 }
 0x14b   : >> { %992 = vst [vmem:[%s1824_s15 + $0x6c] sm:$0xf] %v991_v33  ;;  %933 = sbr.rel (!%p930_p12) target bundleno = 303 (0x12f), region = 118 }
 0x14c   : >> { %994 = vst [vmem:[%s1824_s15 + $0x70] sm:$0xf] %v993_v34 }
 0x14d   : >> { %996 = vst [vmem:[%s1824_s15 + $0x74] sm:$0xf] %v995_v35 }
 0x14e   : >> { %998 = vst [vmem:[%s1824_s15 + $0x78] sm:$0xf] %v997_v36 }
 0x14f   : >> { %1000 = vst [vmem:[%s1824_s15 + $0x7c] sm:$0xf] %v999_v38  ;;  %s2239_s15 = smov %s1007_s28 }
 0x150 PF: > { %s2214_s29 = sand.u32 31, %s2246_s11   ;;  %s1475_s30 = sshll.u32 %s2103_s22, 7 }
 0x151   : > { %s1012_s4 = scalar_lea.vmem %s1998_s10, %s1475_s30 [#allocation2]   ;;  %s1014_s5 = scalar_lea.vmem %s2097_s18, %s1475_s30  }
 0x152   : > { %p1434_p13 = scmp.le.s32.totalorder %s2214_s29, 0 }
 0x153   : > { %s1838_s6 = smov (!%p1434_p13), %s1014_s5   ;;  %s1842_s7 = smov (!%p1434_p13), %s1012_s4  }
 0x154   : > { %1213 = sbr.rel (%p1434_p13) target bundleno = 353 (0x161), region = 123  ;;  %s1846_s8 = smov (!%p1434_p13), 0  }
 0x155   : > { %s1850_s9 = smov (!%p1434_p13), 0  }
 0x159 LB: >> { %v1024_v39 = vld [vmem:[%s1844_s7] sm:$0xf]  ;;  %s1026_s11 = sadd.s32 1, %s1848_s8  ;;  %s1018_s9 = sadd.s32 1, %s1852_s9   ;;  %s1852_s9 = sphi %s1850_s9, %s1018_s9   ;;  %s1848_s8 = sphi %s1846_s8, %s1847_s8   ;;  %s1844_s7 = sphi %s1842_s7, %s1031_s7   ;;  %s1840_s6 = sphi %s1838_s6, %s1032_s6  }
 0x15a   : >> { %1025 = vst [vmem:[%s1840_s6] sm:$0xf] %v1024_v39  ;;  %p1027_p0 = scmp.ge.s32.totalorder %s1026_s11, %s2214_s29  ;;  %p1017_p1 = scmp.ge.s32.totalorder %s1018_s9, %s2214_s29 }
 0x15c   : >> { %s2250_s11 = smov (%p1027_p0, %s1026_s11), 0  ;;  %1020 = sbr.rel (!%p1017_p1) target bundleno = 345 (0x159), region = 129 }
 0x15d   : >> { %s1435_s10 = sshll.u32 %s2250_s11, 2  ;;  %s1847_s8 = smov %s2250_s11  }
 0x15e   : >> { %s1031_s7 = scalar_lea.vmem %s1012_s4, %s1435_s10 [#allocation2]   ;;  %s1032_s6 = scalar_lea.vmem %s1014_s5, %s1435_s10  }
 0x161 PF: > { %p10_p2 = scmp.ge.s32.totalorder %s1889_s16, 6   ;;  %s2242_s12 = smov %s1816_s13 }
 0x162   : > { %s2243_s13 = smov %s1897_s19  ;;  %s2244_s14 = smov %s1889_s16 }
 0x163   :  { %12 = sbr.rel (!%p10_p2) target bundleno = 2 (0x2), region = 140 }

// kernel: conv_encoder_forward.5
= control target key start
LH: loop header
LB: loop body
LE: loop exit
PB: predicated region body
PF: predicated region fallthrough
CT: control target
= control target key end

     0   :  { %s1139_s1 = inlined_call_operand.vmem [shape: bf16[128,128], index: 1, kind: input, shape index: {}]   ;;  %s1140_s2 = inlined_call_operand.vmem [shape: f32[1,128], index: 2, kind: input, shape index: {}]   ;;  %s1141_s0 = inlined_call_operand.vmem [shape: bf16[392,128], index: 0, kind: input, shape index: {}]   ;;  %s1142_s3 = inlined_call_operand.vmem [shape: bf16[392,128], index: 3, kind: output, shape index: {}]  }
   0x1   :  { %v722_v0 = vld [vmem:[%s1139_s1 + $0x38] sm:$0xff]  ;;  %v721_v1 = vld [vmem:[%s1139_s1 + $0x30] sm:$0xff]  ;;  %v720_v2 = vld [vmem:[%s1139_s1 + $0x28] sm:$0xff] }
   0x2   :  { %867 = vmatpush.bf16.msra.mxu2 %v722_v0  ;;  %279 = vmatpush.bf16.msra.mxu0 %v722_v0  ;;  %v719_v3 = vld [vmem:[%s1139_s1 + $0x20] sm:$0xff]  ;;  %v718_v4 = vld [vmem:[%s1139_s1 + $0x18] sm:$0xff]  ;;  %v717_v5 = vld [vmem:[%s1139_s1 + $0x10] sm:$0xff] }
   0x3   :  { %866 = vmatpush.bf16.msra.mxu1 %v722_v0  ;;  %868 = vmatpush.bf16.msra.mxu3 %v722_v0  ;;  %v716_v6 = vld [vmem:[%s1139_s1 + $0x8] sm:$0xff]  ;;  %v715_v7 = vld [vmem:[%s1139_s1] sm:$0xff]  ;;  %v697_v10 = vld [vmem:[%s1141_s0 + $0x30] sm:$0xff] }
   0x4   :  { %v703_v8 = vld [vmem:[%s1141_s0 + $0x60] sm:$0xff]  ;;  %v710_v11 = vld [vmem:[%s1141_s0 + $0x98] sm:$0xff]  ;;  %v704_v12 = vld [vmem:[%s1141_s0 + $0x68] sm:$0xff] }
   0x5   :  { %v691_v9 = vld [vmem:[%s1141_s0] sm:$0xff]  ;;  %v692_v13 = vld [vmem:[%s1141_s0 + $0x8] sm:$0xff]  ;;  %v698_v14 = vld [vmem:[%s1141_s0 + $0x38] sm:$0xff] }
   0x6   :  { %870 = vmatpush.bf16.msra.mxu2 %v721_v1  ;;  %280 = vmatpush.bf16.msra.mxu0 %v721_v1  ;;  %v711_v15 = vld [vmem:[%s1141_s0 + $0xa0] sm:$0xff]  ;;  %v705_v16 = vld [vmem:[%s1141_s0 + $0x70] sm:$0xff]  ;;  %v712_v19 = vld [vmem:[%s1141_s0 + $0xa8] sm:$0xff] }
   0x7   :  { %869 = vmatpush.bf16.msra.mxu1 %v721_v1  ;;  %871 = vmatpush.bf16.msra.mxu3 %v721_v1  ;;  %v693_v17 = vld [vmem:[%s1141_s0 + $0x10] sm:$0xff]  ;;  %v699_v18 = vld [vmem:[%s1141_s0 + $0x40] sm:$0xff]  ;;  %v706_v20 = vld [vmem:[%s1141_s0 + $0x78] sm:$0xff] }
   0x8   :  { %v694_v21 = vld [vmem:[%s1141_s0 + $0x18] sm:$0xff]  ;;  %v700_v22 = vld [vmem:[%s1141_s0 + $0x48] sm:$0xff]  ;;  %v713_v23 = vld [vmem:[%s1141_s0 + $0xb0] sm:$0xff] }
   0x9   :  { %v707_v24 = vld [vmem:[%s1141_s0 + $0x80] sm:$0xff]  ;;  %v701_v26 = vld [vmem:[%s1141_s0 + $0x50] sm:$0xff]  ;;  %v714_v27 = vld [vmem:[%s1141_s0 + $0xb8] sm:$0xff] }
   0xa   :  { %873 = vmatpush.bf16.msra.mxu2 %v720_v2  ;;  %281 = vmatpush.bf16.msra.mxu0 %v720_v2  ;;  %v695_v25 = vld [vmem:[%s1141_s0 + $0x20] sm:$0xff]  ;;  %v708_v30 = vld [vmem:[%s1141_s0 + $0x88] sm:$0xff]  ;;  %v702_v32 = vld [vmem:[%s1141_s0 + $0x58] sm:$0xff] }
   0xb   :  { %872 = vmatpush.bf16.msra.mxu1 %v720_v2  ;;  %874 = vmatpush.bf16.msra.mxu3 %v720_v2  ;;  %v62_v28 = vld [vmem:[%s1141_s0 + $0xc0] sm:$0xf]  ;;  %v696_v31 = vld [vmem:[%s1141_s0 + $0x28] sm:$0xff]  ;;  %v709_v34 = vld [vmem:[%s1141_s0 + $0x90] sm:$0xff] }
   0xc   :  { %v180_v29 = vunpack.c.l.b16 %v62_v28  ;;  %v1013_v37 = vld [vmem:[%s1140_s2] ss:$0 sm:$0xff] }
   0xe   :  { %876 = vmatpush.bf16.msra.mxu2 %v719_v3  ;;  %282 = vmatpush.bf16.msra.mxu0 %v719_v3  ;;  %v205_v33 = vpack.c.b16 %v180_v29, %v180_v29 }
   0xf   :  { %875 = vmatpush.bf16.msra.mxu1 %v719_v3  ;;  %877 = vmatpush.bf16.msra.mxu3 %v719_v3 }
  0x12   :  { %879 = vmatpush.bf16.msra.mxu2 %v718_v4  ;;  %283 = vmatpush.bf16.msra.mxu0 %v718_v4 }
  0x13   :  { %878 = vmatpush.bf16.msra.mxu1 %v718_v4  ;;  %880 = vmatpush.bf16.msra.mxu3 %v718_v4 }
  0x16   :  { %882 = vmatpush.bf16.msra.mxu2 %v717_v5  ;;  %284 = vmatpush.bf16.msra.mxu0 %v717_v5 }
  0x17   :  { %881 = vmatpush.bf16.msra.mxu1 %v717_v5  ;;  %883 = vmatpush.bf16.msra.mxu3 %v717_v5 }
  0x1a   :  { %885 = vmatpush.bf16.msra.mxu2 %v716_v6  ;;  %285 = vmatpush.bf16.msra.mxu0 %v716_v6 }
  0x1b   :  { %884 = vmatpush.bf16.msra.mxu1 %v716_v6  ;;  %886 = vmatpush.bf16.msra.mxu3 %v716_v6 }
  0x1e   :  { %888 = vmatpush.bf16.msra.mxu2 %v715_v7  ;;  %286 = vmatpush.bf16.msra.mxu0 %v715_v7 }
  0x1f   :  { %887 = vmatpush.bf16.msra.mxu1 %v715_v7  ;;  %889 = vmatpush.bf16.msra.mxu3 %v715_v7 }
  0x21   :  { %347 = vmatmul.bf16.vlgmr.msra.gmra.mxu2 %v703_v8  ;;  %287 = vmatmul.bf16.vlgmr.msra.gmra.mxu0 %v691_v9 }
  0x22   :  { %317 = vmatmul.bf16.vlgmr.msra.gmra.mxu1 %v697_v10  ;;  %382 = vmatmul.bf16.vlgmr.msra.gmra.mxu3 %v710_v11 }
  0x31   :  { %352 = vmatmul.bf16.gmra.mxu2 %v704_v12  ;;  %292 = vmatmul.bf16.gmra.mxu0 %v692_v13 }
  0x32   :  { %322 = vmatmul.bf16.gmra.mxu1 %v698_v14  ;;  %387 = vmatmul.bf16.gmra.mxu3 %v711_v15 }
  0x41   :  { %357 = vmatmul.bf16.gmra.mxu2 %v705_v16  ;;  %297 = vmatmul.bf16.gmra.mxu0 %v693_v17 }
  0x42   :  { %327 = vmatmul.bf16.gmra.mxu1 %v699_v18  ;;  %392 = vmatmul.bf16.gmra.mxu3 %v712_v19 }
  0x51   :  { %362 = vmatmul.bf16.gmra.mxu2 %v706_v20  ;;  %302 = vmatmul.bf16.gmra.mxu0 %v694_v21 }
  0x52   :  { %332 = vmatmul.bf16.gmra.mxu1 %v700_v22  ;;  %397 = vmatmul.bf16.gmra.mxu3 %v713_v23 }
  0x61   :  { %367 = vmatmul.bf16.gmra.mxu2 %v707_v24  ;;  %307 = vmatmul.bf16.gmra.mxu0 %v695_v25 }
  0x62   :  { %337 = vmatmul.bf16.gmra.mxu1 %v701_v26  ;;  %402 = vmatmul.bf16.gmra.mxu3 %v714_v27 }
  0x71   :  { %372 = vmatmul.bf16.gmra.mxu2 %v708_v30  ;;  %312 = vmatmul.bf16.gmra.mxu0 %v696_v31 }
  0x72   :  { %342 = vmatmul.bf16.gmra.mxu1 %v702_v32  ;;  %407 = vmatmul.bf16.gmra.mxu3 %v205_v33 }
  0x81   :  { %377 = vmatmul.bf16.gmra.mxu2 %v709_v34 }
  0x9e   :  { %v288_v35 = vpop.f32.mrf.mxu0 }
  0x9f   :  { %v318_v36 = vpop.f32.mrf.mxu1  ;;  %v289_v38 = vadd.f32 %v1013_v37, %v288_v35 }
  0xa0   :  { %v319_v40 = vadd.f32 %v1013_v37, %v318_v36 }
  0xa1   :  { %v412_v43 = vmax.f32 %v289_v38, 0.0 }
  0xa2   :  { %v424_v46 = vmax.f32 %v319_v40, 0.0 }
  0xa4   :  { %v348_v39 = vpop.f32.mrf.mxu2 }
  0xa5   :  { %v383_v41 = vpop.f32.mrf.mxu3  ;;  %v349_v51 = vadd.f32 %v1013_v37, %v348_v39 }
  0xa6   :  { %v290_v42 = vpop.f32.mrf.mxu0  ;;  %v384_v49 = vadd.f32 %v1013_v37, %v383_v41 }
  0xa7   :  { %v291_v44 = vadd.f32 %v1013_v37, %v290_v42  ;;  %v320_v45 = vpop.f32.mrf.mxu1  ;;  %v436_v60 = vmax.f32 %v349_v51, 0.0 }
  0xa8   :  { %v321_v47 = vadd.f32 %v1013_v37, %v320_v45  ;;  %v450_v57 = vmax.f32 %v384_v49, 0.0 }
  0xa9   :  { %v413_v48 = vmax.f32 %v291_v44, 0.0 }
  0xaa   :  { %v425_v50 = vmax.f32 %v321_v47, 0.0 }
  0xab   :  { %v726_v52 = vpack.c.bf16 %v413_v48, %v412_v43 }
  0xac   :  { %v350_v53 = vpop.f32.mrf.mxu2  ;;  %v756_v54 = vpack.c.bf16 %v425_v50, %v424_v46 }
  0xad   :  { %v351_v55 = vadd.f32 %v1013_v37, %v350_v53  ;;  %727 = vst [vmem:[%s1142_s3] sm:$0xff] %v726_v52   ;;  %v385_v56 = vpop.f32.mrf.mxu3 }
  0xae   :  { %848 = vst [vmem:[%s1142_s3 + $0x30] sm:$0xff] %v756_v54   ;;  %v386_v58 = vadd.f32 %v1013_v37, %v385_v56  ;;  %v293_v59 = vpop.f32.mrf.mxu0 }
  0xaf   :  { %v437_v61 = vmax.f32 %v351_v55, 0.0  ;;  %v323_v62 = vpop.f32.mrf.mxu1  ;;  %v294_v2 = vadd.f32 %v1013_v37, %v293_v59 }
  0xb0   :  { %v451_v63 = vmax.f32 %v386_v58, 0.0  ;;  %v324_v4 = vadd.f32 %v1013_v37, %v323_v62 }
  0xb1   :  { %v786_v0 = vpack.c.bf16 %v437_v61, %v436_v60  ;;  %v414_v7 = vmax.f32 %v294_v2, 0.0 }
  0xb2   :  { %v821_v1 = vpack.c.bf16 %v451_v63, %v450_v57  ;;  %v426_v10 = vmax.f32 %v324_v4, 0.0 }
  0xb3   :  { %854 = vst [vmem:[%s1142_s3 + $0x60] sm:$0xff] %v786_v0  }
  0xb4   :  { %v353_v3 = vpop.f32.mrf.mxu2  ;;  %861 = vst [vmem:[%s1142_s3 + $0x98] sm:$0xff] %v821_v1  }
  0xb5   :  { %v388_v5 = vpop.f32.mrf.mxu3  ;;  %v354_v15 = vadd.f32 %v1013_v37, %v353_v3 }
  0xb6   :  { %v295_v6 = vpop.f32.mrf.mxu0  ;;  %v389_v13 = vadd.f32 %v1013_v37, %v388_v5 }
  0xb7   :  { %v296_v8 = vadd.f32 %v1013_v37, %v295_v6  ;;  %v325_v9 = vpop.f32.mrf.mxu1  ;;  %v438_v24 = vmax.f32 %v354_v15, 0.0 }
  0xb8   :  { %v326_v11 = vadd.f32 %v1013_v37, %v325_v9  ;;  %v452_v21 = vmax.f32 %v389_v13, 0.0 }
  0xb9   :  { %v415_v12 = vmax.f32 %v296_v8, 0.0 }
  0xba   :  { %v427_v14 = vmax.f32 %v326_v11, 0.0 }
  0xbb   :  { %v731_v16 = vpack.c.bf16 %v415_v12, %v414_v7 }
  0xbc   :  { %v355_v17 = vpop.f32.mrf.mxu2  ;;  %v761_v18 = vpack.c.bf16 %v427_v14, %v426_v10 }
  0xbd   :  { %v356_v19 = vadd.f32 %v1013_v37, %v355_v17  ;;  %843 = vst [vmem:[%s1142_s3 + $0x8] sm:$0xff] %v731_v16   ;;  %v390_v20 = vpop.f32.mrf.mxu3 }
  0xbe   :  { %849 = vst [vmem:[%s1142_s3 + $0x38] sm:$0xff] %v761_v18   ;;  %v391_v22 = vadd.f32 %v1013_v37, %v390_v20  ;;  %v298_v23 = vpop.f32.mrf.mxu0 }
  0xbf   :  { %v439_v25 = vmax.f32 %v356_v19, 0.0  ;;  %v328_v26 = vpop.f32.mrf.mxu1  ;;  %v299_v30 = vadd.f32 %v1013_v37, %v298_v23 }
  0xc0   :  { %v453_v27 = vmax.f32 %v391_v22, 0.0  ;;  %v329_v32 = vadd.f32 %v1013_v37, %v328_v26 }
  0xc1   :  { %v791_v28 = vpack.c.bf16 %v439_v25, %v438_v24  ;;  %v416_v35 = vmax.f32 %v299_v30, 0.0 }
  0xc2   :  { %v826_v29 = vpack.c.bf16 %v453_v27, %v452_v21  ;;  %v428_v39 = vmax.f32 %v329_v32, 0.0 }
  0xc3   :  { %855 = vst [vmem:[%s1142_s3 + $0x68] sm:$0xff] %v791_v28  }
  0xc4   :  { %v358_v31 = vpop.f32.mrf.mxu2  ;;  %862 = vst [vmem:[%s1142_s3 + $0xa0] sm:$0xff] %v826_v29  }
  0xc5   :  { %v393_v33 = vpop.f32.mrf.mxu3  ;;  %v359_v44 = vadd.f32 %v1013_v37, %v358_v31 }
  0xc6   :  { %v300_v34 = vpop.f32.mrf.mxu0  ;;  %v394_v42 = vadd.f32 %v1013_v37, %v393_v33 }
  0xc7   :  { %v301_v36 = vadd.f32 %v1013_v37, %v300_v34  ;;  %v330_v38 = vpop.f32.mrf.mxu1  ;;  %v440_v53 = vmax.f32 %v359_v44, 0.0 }
  0xc8   :  { %v331_v40 = vadd.f32 %v1013_v37, %v330_v38  ;;  %v454_v50 = vmax.f32 %v394_v42, 0.0 }
  0xc9   :  { %v417_v41 = vmax.f32 %v301_v36, 0.0 }
  0xca   :  { %v429_v43 = vmax.f32 %v331_v40, 0.0 }
  0xcb   :  { %v736_v45 = vpack.c.bf16 %v417_v41, %v416_v35 }
  0xcc   :  { %v360_v46 = vpop.f32.mrf.mxu2  ;;  %v766_v47 = vpack.c.bf16 %v429_v43, %v428_v39 }
  0xcd   :  { %v361_v48 = vadd.f32 %v1013_v37, %v360_v46  ;;  %844 = vst [vmem:[%s1142_s3 + $0x10] sm:$0xff] %v736_v45   ;;  %v395_v49 = vpop.f32.mrf.mxu3 }
  0xce   :  { %850 = vst [vmem:[%s1142_s3 + $0x40] sm:$0xff] %v766_v47   ;;  %v396_v51 = vadd.f32 %v1013_v37, %v395_v49  ;;  %v303_v52 = vpop.f32.mrf.mxu0 }
  0xcf   :  { %v441_v54 = vmax.f32 %v361_v48, 0.0  ;;  %v333_v55 = vpop.f32.mrf.mxu1  ;;  %v304_v59 = vadd.f32 %v1013_v37, %v303_v52 }
  0xd0   :  { %v455_v56 = vmax.f32 %v396_v51, 0.0  ;;  %v334_v61 = vadd.f32 %v1013_v37, %v333_v55 }
  0xd1   :  { %v796_v57 = vpack.c.bf16 %v441_v54, %v440_v53  ;;  %v418_v0 = vmax.f32 %v304_v59, 0.0 }
  0xd2   :  { %v831_v58 = vpack.c.bf16 %v455_v56, %v454_v50  ;;  %v430_v3 = vmax.f32 %v334_v61, 0.0 }
  0xd3   :  { %856 = vst [vmem:[%s1142_s3 + $0x70] sm:$0xff] %v796_v57  }
  0xd4   :  { %v363_v60 = vpop.f32.mrf.mxu2  ;;  %863 = vst [vmem:[%s1142_s3 + $0xa8] sm:$0xff] %v831_v58  }
  0xd5   :  { %v398_v62 = vpop.f32.mrf.mxu3  ;;  %v364_v8 = vadd.f32 %v1013_v37, %v363_v60 }
  0xd6   :  { %v305_v63 = vpop.f32.mrf.mxu0  ;;  %v399_v6 = vadd.f32 %v1013_v37, %v398_v62 }
  0xd7   :  { %v306_v1 = vadd.f32 %v1013_v37, %v305_v63  ;;  %v335_v2 = vpop.f32.mrf.mxu1  ;;  %v442_v17 = vmax.f32 %v364_v8, 0.0 }
  0xd8   :  { %v336_v4 = vadd.f32 %v1013_v37, %v335_v2  ;;  %v456_v14 = vmax.f32 %v399_v6, 0.0 }
  0xd9   :  { %v419_v5 = vmax.f32 %v306_v1, 0.0 }
  0xda   :  { %v431_v7 = vmax.f32 %v336_v4, 0.0 }
  0xdb   :  { %v741_v9 = vpack.c.bf16 %v419_v5, %v418_v0 }
  0xdc   :  { %v365_v10 = vpop.f32.mrf.mxu2  ;;  %v771_v11 = vpack.c.bf16 %v431_v7, %v430_v3 }
  0xdd   :  { %v366_v12 = vadd.f32 %v1013_v37, %v365_v10  ;;  %845 = vst [vmem:[%s1142_s3 + $0x18] sm:$0xff] %v741_v9   ;;  %v400_v13 = vpop.f32.mrf.mxu3 }
  0xde   :  { %851 = vst [vmem:[%s1142_s3 + $0x48] sm:$0xff] %v771_v11   ;;  %v401_v15 = vadd.f32 %v1013_v37, %v400_v13  ;;  %v308_v16 = vpop.f32.mrf.mxu0 }
  0xdf   :  { %v443_v18 = vmax.f32 %v366_v12, 0.0  ;;  %v338_v19 = vpop.f32.mrf.mxu1  ;;  %v309_v23 = vadd.f32 %v1013_v37, %v308_v16 }
  0xe0   :  { %v457_v20 = vmax.f32 %v401_v15, 0.0  ;;  %v339_v25 = vadd.f32 %v1013_v37, %v338_v19 }
  0xe1   :  { %v801_v21 = vpack.c.bf16 %v443_v18, %v442_v17  ;;  %v420_v28 = vmax.f32 %v309_v23, 0.0 }
  0xe2   :  { %v836_v22 = vpack.c.bf16 %v457_v20, %v456_v14  ;;  %v432_v31 = vmax.f32 %v339_v25, 0.0 }
  0xe3   :  { %857 = vst [vmem:[%s1142_s3 + $0x78] sm:$0xff] %v801_v21  }
  0xe4   :  { %v368_v24 = vpop.f32.mrf.mxu2  ;;  %864 = vst [vmem:[%s1142_s3 + $0xb0] sm:$0xff] %v836_v22  }
  0xe5   :  { %v403_v26 = vpop.f32.mrf.mxu3  ;;  %v369_v36 = vadd.f32 %v1013_v37, %v368_v24 }
  0xe6   :  { %v310_v27 = vpop.f32.mrf.mxu0  ;;  %v404_v34 = vadd.f32 %v1013_v37, %v403_v26 }
  0xe7   :  { %v311_v29 = vadd.f32 %v1013_v37, %v310_v27  ;;  %v340_v30 = vpop.f32.mrf.mxu1  ;;  %v444_v46 = vmax.f32 %v369_v36, 0.0 }
  0xe8   :  { %v341_v32 = vadd.f32 %v1013_v37, %v340_v30  ;;  %v458_v43 = vmax.f32 %v404_v34, 0.0 }
  0xe9   :  { %v421_v33 = vmax.f32 %v311_v29, 0.0 }
  0xea   :  { %v433_v35 = vmax.f32 %v341_v32, 0.0 }
  0xeb   :  { %v746_v38 = vpack.c.bf16 %v421_v33, %v420_v28 }
  0xec   :  { %v370_v39 = vpop.f32.mrf.mxu2  ;;  %v776_v40 = vpack.c.bf16 %v433_v35, %v432_v31 }
  0xed   :  { %v371_v41 = vadd.f32 %v1013_v37, %v370_v39  ;;  %846 = vst [vmem:[%s1142_s3 + $0x20] sm:$0xff] %v746_v38   ;;  %v405_v42 = vpop.f32.mrf.mxu3 }
  0xee   :  { %852 = vst [vmem:[%s1142_s3 + $0x50] sm:$0xff] %v776_v40   ;;  %v406_v44 = vadd.f32 %v1013_v37, %v405_v42  ;;  %v313_v45 = vpop.f32.mrf.mxu0 }
  0xef   :  { %v445_v47 = vmax.f32 %v371_v41, 0.0  ;;  %v343_v48 = vpop.f32.mrf.mxu1  ;;  %v314_v52 = vadd.f32 %v1013_v37, %v313_v45 }
  0xf0   :  { %v459_v49 = vmax.f32 %v406_v44, 0.0  ;;  %v344_v54 = vadd.f32 %v1013_v37, %v343_v48 }
  0xf1   :  { %v806_v50 = vpack.c.bf16 %v445_v47, %v444_v46  ;;  %v422_v58 = vmax.f32 %v314_v52, 0.0 }
  0xf2   :  { %v841_v51 = vpack.c.bf16 %v459_v49, %v458_v43  ;;  %v434_v61 = vmax.f32 %v344_v54, 0.0 }
  0xf3   :  { %858 = vst [vmem:[%s1142_s3 + $0x80] sm:$0xff] %v806_v50  }
  0xf4   :  { %v373_v53 = vpop.f32.mrf.mxu2  ;;  %865 = vst [vmem:[%s1142_s3 + $0xb8] sm:$0xff] %v841_v51  }
  0xf5   :  { %v408_v55 = vpop.f32.mrf.mxu3  ;;  %v374_v3 = vadd.f32 %v1013_v37, %v373_v53 }
  0xf6   :  { %v409_v56 = vadd.f32 %v1013_v37, %v408_v55  ;;  %v315_v57 = vpop.f32.mrf.mxu0 }
  0xf7   :  { %v316_v59 = vadd.f32 %v1013_v37, %v315_v57  ;;  %v345_v60 = vpop.f32.mrf.mxu1  ;;  %v446_v9 = vmax.f32 %v374_v3, 0.0 }
  0xf8   :  { %v460_v62 = vmax.f32 %v409_v56, 0.0  ;;  %v346_v63 = vadd.f32 %v1013_v37, %v345_v60 }
  0xf9   :  { %v423_v0 = vmax.f32 %v316_v59, 0.0 }
  0xfa   :  { %v509_v1 = vpack.c.bf16 %v460_v62, %v460_v62  ;;  %v435_v2 = vmax.f32 %v346_v63, 0.0 }
  0xfb   :  { %v751_v4 = vpack.c.bf16 %v423_v0, %v422_v58 }
  0xfc   :  { %v375_v5 = vpop.f32.mrf.mxu2  ;;  %558 = vst [vmem:[%s1142_s3 + $0xc0] sm:$0xf] %v509_v1  ;;  %v781_v6 = vpack.c.bf16 %v435_v2, %v434_v61 }
  0xfd   :  { %v376_v7 = vadd.f32 %v1013_v37, %v375_v5  ;;  %847 = vst [vmem:[%s1142_s3 + $0x28] sm:$0xff] %v751_v4   ;;  %v410_v8 = vpop.f32.mrf.mxu3 }
  0xfe   :  { %853 = vst [vmem:[%s1142_s3 + $0x58] sm:$0xff] %v781_v6  }
  0xff   :  { %v447_v10 = vmax.f32 %v376_v7, 0.0 }
 0x101   :  { %v811_v11 = vpack.c.bf16 %v447_v10, %v446_v9 }
 0x103   :  { %859 = vst [vmem:[%s1142_s3 + $0x88] sm:$0xff] %v811_v11  }
 0x104   :  { %v378_v12 = vpop.f32.mrf.mxu2 }
 0x105   :  { %v379_v13 = vadd.f32 %v1013_v37, %v378_v12 }
 0x107   :  { %v448_v16 = vmax.f32 %v379_v13, 0.0 }
 0x10c   :  { %v380_v14 = vpop.f32.mrf.mxu2 }
 0x10d   :  { %v381_v15 = vadd.f32 %v1013_v37, %v380_v14 }
 0x10f   :  { %v449_v17 = vmax.f32 %v381_v15, 0.0 }
 0x111   :  { %v816_v18 = vpack.c.bf16 %v449_v17, %v448_v16 }
 0x113   :  { %860 = vst [vmem:[%s1142_s3 + $0x90] sm:$0xff] %v816_v18  }

// kernel: conv_encoder_forward.6
= control target key start
LH: loop header
LB: loop body
LE: loop exit
PB: predicated region body
PF: predicated region fallthrough
CT: control target
= control target key end

     0   :  { %s596_s1 = inlined_call_operand.vmem [shape: bf16[256,128], index: 1, kind: input, shape index: {}]   ;;  %s597_s2 = inlined_call_operand.vmem [shape: f32[1,128], index: 2, kind: input, shape index: {}]   ;;  %s598_s0 = inlined_call_operand.vmem [shape: bf16[72,256], index: 0, kind: input, shape index: {}]   ;;  %s599_s3 = inlined_call_operand.vmem [shape: bf16[72,128], index: 3, kind: output, shape index: {}]  }
   0x1   :  { %v410_v0 = vld [vmem:[%s596_s1 + $0x38] sm:$0xff]  ;;  %v409_v2 = vld [vmem:[%s596_s1 + $0x30] sm:$0xff]  ;;  %v408_v4 = vld [vmem:[%s596_s1 + $0x28] sm:$0xff] }
   0x2   :  { %v418_v1 = vld [vmem:[%s596_s1 + $0x78] sm:$0xff]  ;;  %202 = vmatpush.bf16.msra.mxu0 %v410_v0  ;;  %442 = vmatpush.bf16.msra.mxu2 %v410_v0  ;;  %v417_v3 = vld [vmem:[%s596_s1 + $0x70] sm:$0xff]  ;;  %v416_v5 = vld [vmem:[%s596_s1 + $0x68] sm:$0xff] }
   0x3   :  { %235 = vmatpush.bf16.msra.mxu1 %v418_v1  ;;  %450 = vmatpush.bf16.msra.mxu3 %v418_v1  ;;  %v407_v6 = vld [vmem:[%s596_s1 + $0x20] sm:$0xff]  ;;  %v406_v8 = vld [vmem:[%s596_s1 + $0x18] sm:$0xff]  ;;  %v405_v10 = vld [vmem:[%s596_s1 + $0x10] sm:$0xff] }
   0x4   :  { %v415_v7 = vld [vmem:[%s596_s1 + $0x60] sm:$0xff]  ;;  %v414_v9 = vld [vmem:[%s596_s1 + $0x58] sm:$0xff]  ;;  %v413_v11 = vld [vmem:[%s596_s1 + $0x50] sm:$0xff] }
   0x5   :  { %v404_v12 = vld [vmem:[%s596_s1 + $0x8] sm:$0xff]  ;;  %v403_v14 = vld [vmem:[%s596_s1] sm:$0xff]  ;;  %v401_v22 = vld [vmem:[%s598_s0 + $0x34] sm:$0xf] }
   0x6   :  { %203 = vmatpush.bf16.msra.mxu0 %v409_v2  ;;  %443 = vmatpush.bf16.msra.mxu2 %v409_v2  ;;  %v412_v13 = vld [vmem:[%s596_s1 + $0x48] sm:$0xff]  ;;  %v411_v15 = vld [vmem:[%s596_s1 + $0x40] sm:$0xff]  ;;  %v327_v23 = vld [vmem:[%s598_s0 + $0x38] sm:$0xf0] }
   0x7   :  { %236 = vmatpush.bf16.msra.mxu1 %v417_v3  ;;  %451 = vmatpush.bf16.msra.mxu3 %v417_v3  ;;  %v301_v16 = vld [vmem:[%s598_s0] sm:$0xf]  ;;  %v396_v17 = vld [vmem:[%s598_s0 + $0x4] sm:$0xf0]  ;;  %v395_v20 = vld [vmem:[%s598_s0 + $0x4] sm:$0xf]  ;;  %v330_v27 = vor.u32 %v401_v22, %v327_v23 }
   0x8   :  { %v317_v18 = vld [vmem:[%s598_s0 + $0x20] sm:$0xf]  ;;  %v400_v19 = vld [vmem:[%s598_s0 + $0x24] sm:$0xf0]  ;;  %v303_v21 = vld [vmem:[%s598_s0 + $0x8] sm:$0xf0]  ;;  %v302_v24 = vor.u32 %v396_v17, %v301_v16 }
   0x9   :  { %v318_v25 = vor.u32 %v400_v19, %v317_v18  ;;  %v306_v26 = vor.u32 %v395_v20, %v303_v21  ;;  %v22_v28 = vld [vmem:[%s598_s0 + $0x40] sm:$0xff]  ;;  %v309_v29 = vld [vmem:[%s598_s0 + $0x10] sm:$0xf]  ;;  %v398_v30 = vld [vmem:[%s598_s0 + $0x14] sm:$0xf0] }
   0xa   :  { %204 = vmatpush.bf16.msra.mxu0 %v408_v4  ;;  %444 = vmatpush.bf16.msra.mxu2 %v408_v4  ;;  %v325_v31 = vld [vmem:[%s598_s0 + $0x30] sm:$0xf]  ;;  %v402_v32 = vld [vmem:[%s598_s0 + $0x34] sm:$0xf0]  ;;  %v85_v33 = vunpack.c.h.b16 %v22_v28  ;;  %v397_v34 = vld [vmem:[%s598_s0 + $0x14] sm:$0xf]  ;;  %v310_v36 = vor.u32 %v398_v30, %v309_v29  ;;  %v84_v40 = vunpack.c.l.b16 %v22_v28 }
   0xb   :  { %237 = vmatpush.bf16.msra.mxu1 %v416_v5  ;;  %452 = vmatpush.bf16.msra.mxu3 %v416_v5  ;;  %v311_v35 = vld [vmem:[%s598_s0 + $0x18] sm:$0xf0]  ;;  %v326_v37 = vor.u32 %v402_v32, %v325_v31  ;;  %v399_v41 = vld [vmem:[%s598_s0 + $0x24] sm:$0xf]  ;;  %v319_v42 = vld [vmem:[%s598_s0 + $0x28] sm:$0xf0] }
   0xc   :  { %v314_v38 = vor.u32 %v397_v34, %v311_v35  ;;  %v95_v39 = vpack.c.b16 %v85_v33, %v85_v33  ;;  %v94_v43 = vpack.c.b16 %v84_v40, %v84_v40  ;;  %v322_v44 = vor.u32 %v399_v41, %v319_v42  ;;  %v458_v46 = vld [vmem:[%s597_s2] ss:$0 sm:$0xff] }
   0xe   :  { %205 = vmatpush.bf16.msra.mxu0 %v407_v6  ;;  %445 = vmatpush.bf16.msra.mxu2 %v407_v6 }
   0xf   :  { %238 = vmatpush.bf16.msra.mxu1 %v415_v7  ;;  %453 = vmatpush.bf16.msra.mxu3 %v415_v7 }
  0x12   :  { %206 = vmatpush.bf16.msra.mxu0 %v406_v8  ;;  %446 = vmatpush.bf16.msra.mxu2 %v406_v8 }
  0x13   :  { %239 = vmatpush.bf16.msra.mxu1 %v414_v9  ;;  %454 = vmatpush.bf16.msra.mxu3 %v414_v9 }
  0x16   :  { %207 = vmatpush.bf16.msra.mxu0 %v405_v10  ;;  %447 = vmatpush.bf16.msra.mxu2 %v405_v10 }
  0x17   :  { %240 = vmatpush.bf16.msra.mxu1 %v413_v11  ;;  %455 = vmatpush.bf16.msra.mxu3 %v413_v11 }
  0x1a   :  { %208 = vmatpush.bf16.msra.mxu0 %v404_v12  ;;  %448 = vmatpush.bf16.msra.mxu2 %v404_v12 }
  0x1b   :  { %241 = vmatpush.bf16.msra.mxu1 %v412_v13  ;;  %456 = vmatpush.bf16.msra.mxu3 %v412_v13 }
  0x1e   :  { %209 = vmatpush.bf16.msra.mxu0 %v403_v14  ;;  %449 = vmatpush.bf16.msra.mxu2 %v403_v14 }
  0x1f   :  { %242 = vmatpush.bf16.msra.mxu1 %v411_v15  ;;  %457 = vmatpush.bf16.msra.mxu3 %v411_v15 }
  0x21   :  { %210 = vmatmul.bf16.vlgmr.msra.gmra.mxu0 %v302_v24  ;;  %220 = vmatmul.bf16.vlgmr.msra.gmra.mxu2 %v318_v25 }
  0x22   :  { %243 = vmatmul.bf16.vlgmr.msra.gmra.mxu1 %v306_v26  ;;  %258 = vmatmul.bf16.vlgmr.msra.gmra.mxu3 %v330_v27 }
  0x31   :  { %215 = vmatmul.bf16.gmra.mxu0 %v310_v36  ;;  %225 = vmatmul.bf16.gmra.mxu2 %v326_v37 }
  0x32   :  { %248 = vmatmul.bf16.gmra.mxu1 %v314_v38  ;;  %263 = vmatmul.bf16.gmra.mxu3 %v95_v39 }
  0x41   :  { %230 = vmatmul.bf16.gmra.mxu2 %v94_v43 }
  0x42   :  { %253 = vmatmul.bf16.gmra.mxu1 %v322_v44 }
  0x9e   :  { %v211_v45 = vpop.f32.mrf.mxu0 }
  0x9f   :  { %v244_v47 = vpop.f32.mrf.mxu1  ;;  %v212_v48 = vadd.f32 %v458_v46, %v211_v45 }
  0xa1   :  { %v245_v52 = vadd.f32 %v244_v47, %v212_v48 }
  0xa3   :  { %v268_v56 = vmax.f32 %v245_v52, 0.0 }
  0xa4   :  { %v221_v49 = vpop.f32.mrf.mxu2 }
  0xa5   :  { %v259_v50 = vpop.f32.mrf.mxu3  ;;  %v222_v20 = vadd.f32 %v458_v46, %v221_v49 }
  0xa6   :  { %v213_v51 = vpop.f32.mrf.mxu0 }
  0xa7   :  { %v214_v53 = vadd.f32 %v458_v46, %v213_v51  ;;  %v246_v54 = vpop.f32.mrf.mxu1 }
  0xa9   :  { %v247_v55 = vadd.f32 %v246_v54, %v214_v53 }
  0xab   :  { %v269_v57 = vmax.f32 %v247_v55, 0.0 }
  0xac   :  { %v223_v58 = vpop.f32.mrf.mxu2 }
  0xad   :  { %v422_v59 = vpack.c.bf16 %v269_v57, %v268_v56  ;;  %v261_v60 = vpop.f32.mrf.mxu3  ;;  %v224_v23 = vadd.f32 %v458_v46, %v223_v58 }
  0xae   :  { %v216_v61 = vpop.f32.mrf.mxu0 }
  0xaf   :  { %423 = vst [vmem:[%s599_s3] sm:$0xff] %v422_v59   ;;  %v249_v62 = vpop.f32.mrf.mxu1  ;;  %v217_v63 = vadd.f32 %v458_v46, %v216_v61 }
  0xb1   :  { %v250_v3 = vadd.f32 %v249_v62, %v217_v63 }
  0xb3   :  { %v270_v8 = vmax.f32 %v250_v3, 0.0 }
  0xb4   :  { %v226_v0 = vpop.f32.mrf.mxu2 }
  0xb5   :  { %v264_v1 = vpop.f32.mrf.mxu3  ;;  %v227_v6 = vadd.f32 %v458_v46, %v226_v0 }
  0xb6   :  { %v218_v2 = vpop.f32.mrf.mxu0 }
  0xb7   :  { %v219_v4 = vadd.f32 %v458_v46, %v218_v2  ;;  %v251_v5 = vpop.f32.mrf.mxu1  ;;  %v260_v11 = vadd.f32 %v259_v50, %v227_v6 }
  0xb9   :  { %v252_v7 = vadd.f32 %v251_v5, %v219_v4  ;;  %v274_v17 = vmax.f32 %v260_v11, 0.0 }
  0xbb   :  { %v271_v9 = vmax.f32 %v252_v7, 0.0 }
  0xbc   :  { %v228_v10 = vpop.f32.mrf.mxu2 }
  0xbd   :  { %v427_v12 = vpack.c.bf16 %v271_v9, %v270_v8  ;;  %v229_v13 = vadd.f32 %v458_v46, %v228_v10  ;;  %v266_v14 = vpop.f32.mrf.mxu3 }
  0xbf   :  { %439 = vst [vmem:[%s599_s3 + $0x8] sm:$0xff] %v427_v12   ;;  %v262_v15 = vadd.f32 %v261_v60, %v229_v13  ;;  %v254_v16 = vpop.f32.mrf.mxu1 }
  0xc0   :  { %v255_v24 = vadd.f32 %v254_v16, %v222_v20 }
  0xc1   :  { %v275_v18 = vmax.f32 %v262_v15, 0.0 }
  0xc2   :  { %v272_v29 = vmax.f32 %v255_v24, 0.0 }
  0xc3   :  { %v437_v19 = vpack.c.bf16 %v275_v18, %v274_v17 }
  0xc4   :  { %v231_v21 = vpop.f32.mrf.mxu2 }
  0xc5   :  { %441 = vst [vmem:[%s599_s3 + $0x18] sm:$0xff] %v437_v19   ;;  %v232_v22 = vadd.f32 %v458_v46, %v231_v21 }
  0xc7   :  { %v265_v25 = vadd.f32 %v264_v1, %v232_v22  ;;  %v256_v26 = vpop.f32.mrf.mxu1 }
  0xc8   :  { %v257_v27 = vadd.f32 %v256_v26, %v224_v23 }
  0xc9   :  { %v276_v28 = vmax.f32 %v265_v25, 0.0 }
  0xca   :  { %v273_v30 = vmax.f32 %v257_v27, 0.0 }
  0xcb   :  { %v285_v31 = vpack.c.bf16 %v276_v28, %v276_v28 }
  0xcc   :  { %v432_v32 = vpack.c.bf16 %v273_v30, %v272_v29  ;;  %v233_v33 = vpop.f32.mrf.mxu2 }
  0xcd   :  { %294 = vst [vmem:[%s599_s3 + $0x20] sm:$0xf] %v285_v31 }
  0xce   :  { %440 = vst [vmem:[%s599_s3 + $0x10] sm:$0xff] %v432_v32  }

// kernel: conv_encoder_forward.7
= control target key start
LH: loop header
LB: loop body
LE: loop exit
PB: predicated region body
PF: predicated region fallthrough
CT: control target
= control target key end

     0   :  { %s637_s1 = inlined_call_operand.vmem [shape: bf16[512,128], index: 1, kind: input, shape index: {}]   ;;  %s638_s2 = inlined_call_operand.vmem [shape: f32[1,128], index: 2, kind: input, shape index: {}]   ;;  %s639_s0 = inlined_call_operand.vmem [shape: bf16[8,512], index: 0, kind: input, shape index: {}]   ;;  %s640_s3 = inlined_call_operand.vmem [shape: f32[8,128], index: 3, kind: output, shape index: {}]  }
   0x1   :  { %v483_v0 = vld [vmem:[%s637_s1 + $0x38] sm:$0xff]  ;;  %v482_v4 = vld [vmem:[%s637_s1 + $0x30] sm:$0xff]  ;;  %v481_v8 = vld [vmem:[%s637_s1 + $0x28] sm:$0xff] }
   0x2   :  { %v491_v1 = vld [vmem:[%s637_s1 + $0x78] sm:$0xff]  ;;  %290 = vmatpush.bf16.msra.mxu0 %v483_v0  ;;  %v490_v5 = vld [vmem:[%s637_s1 + $0x70] sm:$0xff]  ;;  %v489_v9 = vld [vmem:[%s637_s1 + $0x68] sm:$0xff] }
   0x3   :  { %v499_v2 = vld [vmem:[%s637_s1 + $0xb8] sm:$0xff]  ;;  %303 = vmatpush.bf16.msra.mxu1 %v491_v1  ;;  %v498_v6 = vld [vmem:[%s637_s1 + $0xb0] sm:$0xff]  ;;  %v497_v10 = vld [vmem:[%s637_s1 + $0xa8] sm:$0xff] }
   0x4   :  { %v507_v3 = vld [vmem:[%s637_s1 + $0xf8] sm:$0xff]  ;;  %316 = vmatpush.bf16.msra.mxu2 %v499_v2  ;;  %v506_v7 = vld [vmem:[%s637_s1 + $0xf0] sm:$0xff]  ;;  %v505_v11 = vld [vmem:[%s637_s1 + $0xe8] sm:$0xff] }
   0x5   :  { %329 = vmatpush.bf16.msra.mxu3 %v507_v3  ;;  %v480_v12 = vld [vmem:[%s637_s1 + $0x20] sm:$0xff]  ;;  %v479_v16 = vld [vmem:[%s637_s1 + $0x18] sm:$0xff]  ;;  %v478_v20 = vld [vmem:[%s637_s1 + $0x10] sm:$0xff] }
   0x6   :  { %291 = vmatpush.bf16.msra.mxu0 %v482_v4  ;;  %v488_v13 = vld [vmem:[%s637_s1 + $0x60] sm:$0xff]  ;;  %v487_v17 = vld [vmem:[%s637_s1 + $0x58] sm:$0xff]  ;;  %v486_v21 = vld [vmem:[%s637_s1 + $0x50] sm:$0xff] }
   0x7   :  { %304 = vmatpush.bf16.msra.mxu1 %v490_v5  ;;  %v496_v14 = vld [vmem:[%s637_s1 + $0xa0] sm:$0xff]  ;;  %v495_v18 = vld [vmem:[%s637_s1 + $0x98] sm:$0xff]  ;;  %v494_v22 = vld [vmem:[%s637_s1 + $0x90] sm:$0xff] }
   0x8   :  { %317 = vmatpush.bf16.msra.mxu2 %v498_v6  ;;  %v504_v15 = vld [vmem:[%s637_s1 + $0xe0] sm:$0xff]  ;;  %v503_v19 = vld [vmem:[%s637_s1 + $0xd8] sm:$0xff]  ;;  %v502_v23 = vld [vmem:[%s637_s1 + $0xd0] sm:$0xff] }
   0x9   :  { %330 = vmatpush.bf16.msra.mxu3 %v506_v7  ;;  %v477_v24 = vld [vmem:[%s637_s1 + $0x8] sm:$0xff]  ;;  %v14_v26 = vld [vmem:[%s639_s0] sm:$0xff] }
   0xa   :  { %292 = vmatpush.bf16.msra.mxu0 %v481_v8  ;;  %v485_v25 = vld [vmem:[%s637_s1 + $0x48] sm:$0xff]  ;;  %v86_v30 = vunpack.c.l.b16 %v14_v26  ;;  %v87_v31 = vunpack.c.h.b16 %v14_v26  ;;  %v476_v32 = vld [vmem:[%s637_s1] sm:$0xff] }
   0xb   :  { %305 = vmatpush.bf16.msra.mxu1 %v489_v9  ;;  %v493_v27 = vld [vmem:[%s637_s1 + $0x88] sm:$0xff]  ;;  %v484_v33 = vld [vmem:[%s637_s1 + $0x40] sm:$0xff] }
   0xc   :  { %318 = vmatpush.bf16.msra.mxu2 %v497_v10  ;;  %v501_v28 = vld [vmem:[%s637_s1 + $0xc8] sm:$0xff]  ;;  %v492_v36 = vld [vmem:[%s637_s1 + $0x80] sm:$0xff]  ;;  %v90_v38 = vpack.c.b16 %v86_v30, %v86_v30  ;;  %v91_v39 = vpack.c.b16 %v87_v31, %v87_v31 }
   0xd   :  { %331 = vmatpush.bf16.msra.mxu3 %v505_v11  ;;  %v15_v29 = vld [vmem:[%s639_s0 + $0x8] sm:$0xff]  ;;  %v500_v37 = vld [vmem:[%s637_s1 + $0xc0] sm:$0xff] }
   0xe   :  { %293 = vmatpush.bf16.msra.mxu0 %v480_v12  ;;  %v88_v34 = vunpack.c.l.b16 %v15_v29  ;;  %v89_v35 = vunpack.c.h.b16 %v15_v29  ;;  %v508_v42 = vld [vmem:[%s638_s2] ss:$0 sm:$0xff] }
   0xf   :  { %306 = vmatpush.bf16.msra.mxu1 %v488_v13 }
  0x10   :  { %319 = vmatpush.bf16.msra.mxu2 %v496_v14  ;;  %v92_v40 = vpack.c.b16 %v88_v34, %v88_v34  ;;  %v93_v41 = vpack.c.b16 %v89_v35, %v89_v35 }
  0x11   :  { %332 = vmatpush.bf16.msra.mxu3 %v504_v15 }
  0x12   :  { %294 = vmatpush.bf16.msra.mxu0 %v479_v16 }
  0x13   :  { %307 = vmatpush.bf16.msra.mxu1 %v487_v17 }
  0x14   :  { %320 = vmatpush.bf16.msra.mxu2 %v495_v18 }
  0x15   :  { %333 = vmatpush.bf16.msra.mxu3 %v503_v19 }
  0x16   :  { %295 = vmatpush.bf16.msra.mxu0 %v478_v20 }
  0x17   :  { %308 = vmatpush.bf16.msra.mxu1 %v486_v21 }
  0x18   :  { %321 = vmatpush.bf16.msra.mxu2 %v494_v22 }
  0x19   :  { %334 = vmatpush.bf16.msra.mxu3 %v502_v23 }
  0x1a   :  { %296 = vmatpush.bf16.msra.mxu0 %v477_v24 }
  0x1b   :  { %309 = vmatpush.bf16.msra.mxu1 %v485_v25 }
  0x1c   :  { %322 = vmatpush.bf16.msra.mxu2 %v493_v27 }
  0x1d   :  { %335 = vmatpush.bf16.msra.mxu3 %v501_v28 }
  0x1e   :  { %297 = vmatpush.bf16.msra.mxu0 %v476_v32 }
  0x1f   :  { %310 = vmatpush.bf16.msra.mxu1 %v484_v33 }
  0x20   :  { %323 = vmatpush.bf16.msra.mxu2 %v492_v36 }
  0x21   :  { %336 = vmatpush.bf16.msra.mxu3 %v500_v37  ;;  %298 = vmatmul.bf16.vlgmr.msra.gmra.mxu0 %v90_v38 }
  0x22   :  { %311 = vmatmul.bf16.vlgmr.msra.gmra.mxu1 %v91_v39 }
  0x23   :  { %324 = vmatmul.bf16.vlgmr.msra.gmra.mxu2 %v92_v40 }
  0x24   :  { %337 = vmatmul.bf16.vlgmr.msra.gmra.mxu3 %v93_v41 }
  0x9e   :  { %v299_v43 = vpop.f32.mrf.mxu0 }
  0x9f   :  { %v312_v44 = vpop.f32.mrf.mxu1  ;;  %v300_v45 = vadd.f32 %v508_v42, %v299_v43 }
  0xa1   :  { %v313_v46 = vadd.f32 %v312_v44, %v300_v45 }
  0xa6   :  { %v325_v47 = vpop.f32.mrf.mxu2  ;;  %v301_v50 = vpop.f32.mrf.mxu0 }
  0xa7   :  { %v338_v48 = vpop.f32.mrf.mxu3  ;;  %v326_v49 = vadd.f32 %v325_v47, %v313_v46  ;;  %v314_v51 = vpop.f32.mrf.mxu1 }
  0xa9   :  { %v339_v52 = vadd.f32 %v338_v48, %v326_v49 }
  0xab   :  { %v342_v53 = vmax.f32 %v339_v52, 0.0 }
  0xad   :  { %343 = vst [vmem:[%s640_s3] sm:$0xff] %v342_v53 }
  0xae   :  { %v327_v54 = vpop.f32.mrf.mxu2 }
  0xaf   :  { %v340_v55 = vpop.f32.mrf.mxu3 }

</bundles_post_ra>
